<compile_context>
chip_gen: v6e
topology: v6e:2x2x1
jax: 0.10.0
libtpu: 0.0.40
codegen_flags: <defaults>
</compile_context>

<pallas_src>
import functools
import math

import numpy as np
import jax
import jax.numpy as jnp
from jax.experimental import pallas as pl

# ---- hyper-parameters from the reference script ----------------------------
BETA = 1.0
GAMMA = 0.95
LAMBDA_DECAY = 0.01
PLASTICITY_LR = 1e-05

# ---- tiny synthetic "distilgpt2" config -------------------------------------
VOCAB = 64
N_LAYER = 2
N_HEAD = 2
D_MODEL = 32
D_HEAD = D_MODEL // N_HEAD
D_FF = 4 * D_MODEL
MAX_SEQ = 16

LANES = 128
assert VOCAB <= LANES and D_FF <= LANES and D_MODEL <= LANES and D_HEAD <= LANES

# logical plastic (traced) matrices, as in the PyTorch name filtering
PLASTIC_SHAPES = {
    "w_qkv": (D_MODEL, 3 * D_MODEL),
    "w_proj": (D_MODEL, D_MODEL),
    "w_fc": (D_MODEL, D_FF),
    "w_out": (D_FF, D_MODEL),
}
PLASTIC_ORDER = tuple((li, n) for li in range(N_LAYER)
                      for n in ("w_qkv", "w_proj", "w_fc", "w_out"))
TRACE_NAMES = tuple(f"blocks.{li}.{n}" for li, n in PLASTIC_ORDER)

# ---- lane-dense packed plastic-buffer layout (head-split, 128-col padded) ---
# per layer: [q_h0 q_h1-interleaved as q,k,v per head] (6 x D_MODEL rows),
#            w_proj (D_MODEL rows), w_fc (D_MODEL rows), w_out (D_FF rows)
P_PER_LAYER = (3 * N_HEAD + 2) * D_MODEL + D_FF          # 384
FLAT_ROWS = N_LAYER * P_PER_LAYER                        # 768
assert FLAT_ROWS % 8 == 0


def _prow(li, kind, h=0):
    base = li * P_PER_LAYER
    if kind in ("q", "k", "v"):
        return base + (3 * h + {"q": 0, "k": 1, "v": 2}[kind]) * D_MODEL
    if kind == "proj":
        return base + 3 * N_HEAD * D_MODEL
    if kind == "fc":
        return base + (3 * N_HEAD + 1) * D_MODEL
    if kind == "out":
        return base + (3 * N_HEAD + 2) * D_MODEL
    raise KeyError(kind)


# row -> logical-param-id (0..4*N_LAYER-1), used to expand 8 scalars to a (768,1) column
_row_ids = []
for _li in range(N_LAYER):
    _row_ids += [_li * 4 + 0] * (3 * N_HEAD * D_MODEL)   # w_qkv
    _row_ids += [_li * 4 + 1] * D_MODEL                  # w_proj
    _row_ids += [_li * 4 + 2] * D_MODEL                  # w_fc
    _row_ids += [_li * 4 + 3] * D_FF                     # w_out
ROW_PARAM_ID = np.asarray(_row_ids, np.int32)
assert ROW_PARAM_ID.shape[0] == FLAT_ROWS

# ---- lane-dense static-buffer layout (LN, biases, tied lm_head) --------------
# per layer rows: 0 ln1_g, 1 ln1_b, 2 ln2_g, 3 ln2_b, 4 b_proj, 5 b_fc, 6 b_out,
#                 7 + 3*h + {0,1,2} -> b_q_h, b_k_h, b_v_h
S_PER_LAYER = 7 + 3 * N_HEAD                             # 13
LNF_G_ROW = N_LAYER * S_PER_LAYER                        # 26
LNF_B_ROW = LNF_G_ROW + 1                                # 27
WTE_ROW = ((LNF_B_ROW + 1 + 7) // 8) * 8                 # 32 (sublane-aligned)
STATIC_ROWS = ((WTE_ROW + D_MODEL + 7) // 8) * 8         # 64


def _spec(shape):
    """Full-array 2-D BlockSpec for grid=(1,)."""
    return pl.BlockSpec(shape, lambda i: (0, 0))


# =============================================================================
# Pallas kernels
# =============================================================================
def _fused_forward_kernel(x_ref, w_ref, s_ref, o_ref, *, batch, seq):
    """Whole 2-layer GPT-2-style forward on one (T, D_MODEL) tile; all weights VMEM-resident."""
    T = batch * seq
    f32 = jnp.float32
    bf16 = jnp.bfloat16
    x = x_ref[...]                                          # (T, D_MODEL) f32

    def vec(row, n):                                        # (1, n) bias/gain row
        return s_ref[row:row + 1, :n]

    def layer_norm(v, g_row, b_row):
        mu = jnp.mean(v, axis=-1, keepdims=True)
        var = jnp.mean(jnp.square(v - mu), axis=-1, keepdims=True)
        return (v - mu) * jax.lax.rsqrt(var + 1e-5) * vec(g_row, D_MODEL) + vec(b_row, D_MODEL)

    # causal + same-sequence (block-diagonal) mask; seq is a power of two -> shifts/ANDs
    row = jax.lax.broadcasted_iota(jnp.int32, (T, T), 0)
    col = jax.lax.broadcasted_iota(jnp.int32, (T, T), 1)
    if seq & (seq - 1) == 0:
        sh = seq.bit_length() - 1
        mask = ((row >> sh) == (col >> sh)) & ((col & (seq - 1)) <= (row & (seq - 1)))
    else:
        mask = ((row // seq) == (col // seq)) & ((col % seq) <= (row % seq))
    neg = f32(-1e30)
    scale = f32(1.0 / math.sqrt(D_HEAD))
    c_gelu = f32(math.sqrt(2.0 / math.pi))

    for li in range(N_LAYER):                               # static unroll (N_LAYER=2)
        sbase = li * S_PER_LAYER
        # ---------------- attention sub-block ----------------
        a_in = layer_norm(x, sbase + 0, sbase + 1)
        a_bf = a_in.astype(bf16)
        proj = jnp.zeros((T, D_MODEL), f32)
        wp0 = _prow(li, "proj")
        for h in range(N_HEAD):                             # static unroll (N_HEAD=2)
            rq, rk, rv = _prow(li, "q", h), _prow(li, "k", h), _prow(li, "v", h)
            q = jnp.dot(a_bf, w_ref[rq:rq + D_MODEL, :D_HEAD].astype(bf16),
                        preferred_element_type=f32) + vec(sbase + 7 + 3 * h + 0, D_HEAD)
            k = jnp.dot(a_bf, w_ref[rk:rk + D_MODEL, :D_HEAD].astype(bf16),
                        preferred_element_type=f32) + vec(sbase + 7 + 3 * h + 1, D_HEAD)
            v = jnp.dot(a_bf, w_ref[rv:rv + D_MODEL, :D_HEAD].astype(bf16),
                        preferred_element_type=f32) + vec(sbase + 7 + 3 * h + 2, D_HEAD)
            # scores = q @ k^T (contract head dim of both) -- no explicit transpose
            s = jax.lax.dot_general(q.astype(bf16), k.astype(bf16),
                                    (((1,), (1,)), ((), ())),
                                    preferred_element_type=f32) * scale
            s = jnp.where(mask, s, neg)
            m = jnp.max(s, axis=-1, keepdims=True)
            p = jnp.exp(s - m)                              # f32 EUP
            p = p * pl.reciprocal(jnp.sum(p, axis=-1, keepdims=True), approx=True)
            o_h = jnp.dot(p.astype(bf16), v.astype(bf16), preferred_element_type=f32)
            # concat(heads) @ W_proj == sum_h (head_h @ W_proj[h-rows])
            wp_h = w_ref[wp0 + h * D_HEAD:wp0 + (h + 1) * D_HEAD, :D_MODEL].astype(bf16)
            proj = proj + jnp.dot(o_h.astype(bf16), wp_h, preferred_element_type=f32)
        x = x + proj + vec(sbase + 4, D_MODEL)

        # ---------------- MLP sub-block ----------------
        m_in = layer_norm(x, sbase + 2, sbase + 3)
        rfc, rout = _prow(li, "fc"), _prow(li, "out")
        hmid = jnp.dot(m_in.astype(bf16), w_ref[rfc:rfc + D_MODEL, :D_FF].astype(bf16),
                       preferred_element_type=f32) + vec(sbase + 5, D_FF)
        # GPT-2 "gelu_new" (tanh approximation), f32 -> EUP
        hmid = 0.5 * hmid * (1.0 + jnp.tanh(c_gelu * (hmid + 0.044715 * hmid * hmid * hmid)))
        x = x + jnp.dot(hmid.astype(bf16), w_ref[rout:rout + D_FF, :D_MODEL].astype(bf16),
                        preferred_element_type=f32) + vec(sbase + 6, D_MODEL)

    x = layer_norm(x, LNF_G_ROW, LNF_B_ROW)
    # tied lm_head: logits = x @ wte^T, padded to 128 lanes -> lane-dense unmasked store
    o_ref[...] = jnp.dot(x.astype(bf16),
                         s_ref[WTE_ROW:WTE_ROW + D_MODEL, :].astype(bf16),
                         preferred_element_type=f32)


def _trace_kernel(t_ref, g_ref, f_ref, o_ref, *, gamma):
    """trace <- gamma*trace + |grad|, one dense (768,128) op; f_ref is (768,1) has-grad column."""
    t = t_ref[...]
    new = gamma * t + jnp.abs(g_ref[...])
    o_ref[...] = jnp.where(f_ref[...] > 0.0, new, t)


def _plastic_kernel(p_ref, t_ref, r_ref, o_ref, *, beta, lambda_decay, lr):
    """param <- param + lr*(beta*reward*trace - lambda_decay*param); r_ref is (768,1) rewards."""
    p = p_ref[...]
    o_ref[...] = p + lr * (beta * r_ref[...] * t_ref[...] - lambda_decay * p)


def _step_kernel(p_ref, t_ref, g_ref, f_ref, r_ref, p_out, t_out,
                 *, gamma, beta, lambda_decay, lr):
    """Fused trace update + plastic update in one pass over both (768,128) buffers."""
    t = t_ref[...]
    new_t = jnp.where(f_ref[...] > 0.0, gamma * t + jnp.abs(g_ref[...]), t)
    t_out[...] = new_t
    p = p_ref[...]
    p_out[...] = p + lr * (beta * r_ref[...] * new_t - lambda_decay * p)


# =============================================================================
# Packing / unpacking helpers
# =============================================================================
def _pack_plastic_arrays(mats):
    """mats: 8 arrays ordered per PLASTIC_ORDER (logical shapes) -> (FLAT_ROWS, LANES) f32."""
    def pad(a):
        a = a.astype(jnp.float32)
        return jnp.pad(a, ((0, 0), (0, LANES - a.shape[1])))
    blocks, idx = [], 0
    for _li in range(N_LAYER):
        w_qkv, w_proj, w_fc, w_out = mats[idx], mats[idx + 1], mats[idx + 2], mats[idx + 3]
        idx += 4
        for h in range(N_HEAD):
            blocks.append(pad(w_qkv[:, h * D_HEAD:(h + 1) * D_HEAD]))
            blocks.append(pad(w_qkv[:, D_MODEL + h * D_HEAD:D_MODEL + (h + 1) * D_HEAD]))
            blocks.append(pad(w_qkv[:, 2 * D_MODEL + h * D_HEAD:2 * D_MODEL + (h + 1) * D_HEAD]))
        blocks.append(pad(w_proj))
        blocks.append(pad(w_fc))
        blocks.append(pad(w_out))
    return jnp.concatenate(blocks, axis=0)


def _unpack_flat_to_dict(flat):
    """(768,128) packed buffer -> dict of logical matrices keyed by PyTorch-style names."""
    out = {}
    for li in range(N_LAYER):
        base = li * P_PER_LAYER
        qp, kp, vp = [], [], []
        for h in range(N_HEAD):
            r = base + 3 * h * D_MODEL
            qp.append(flat[r:r + D_MODEL, :D_HEAD])
            kp.append(flat[r + D_MODEL:r + 2 * D_MODEL, :D_HEAD])
            vp.append(flat[r + 2 * D_MODEL:r + 3 * D_MODEL, :D_HEAD])
        out[f"blocks.{li}.w_qkv"] = jnp.concatenate(qp + kp + vp, axis=1)
        r = base + 3 * N_HEAD * D_MODEL
        out[f"blocks.{li}.w_proj"] = flat[r:r + D_MODEL, :D_MODEL]
        out[f"blocks.{li}.w_fc"] = flat[r + D_MODEL:r + 2 * D_MODEL, :D_FF]
        out[f"blocks.{li}.w_out"] = flat[r + 2 * D_MODEL:r + 2 * D_MODEL + D_FF, :D_MODEL]
    return out


def _pack_static(params):
    """All LN gains/biases, all biases (QKV bias split per head) and wte^T -> (64,128) f32."""
    buf = np.zeros((STATIC_ROWS, LANES), np.float32)
    for li, blk in enumerate(params["blocks"]):
        base = li * S_PER_LAYER
        buf[base + 0, :D_MODEL] = np.asarray(blk["ln1_g"], np.float32)
        buf[base + 1, :D_MODEL] = np.asarray(blk["ln1_b"], np.float32)
        buf[base + 2, :D_MODEL] = np.asarray(blk["ln2_g"], np.float32)
        buf[base + 3, :D_MODEL] = np.asarray(blk["ln2_b"], np.float32)
        buf[base + 4, :D_MODEL] = np.asarray(blk["b_proj"], np.float32)
        buf[base + 5, :D_FF] = np.asarray(blk["b_fc"], np.float32)
        buf[base + 6, :D_MODEL] = np.asarray(blk["b_out"], np.float32)
        bq = np.asarray(blk["b_qkv"], np.float32)
        for h in range(N_HEAD):
            buf[base + 7 + 3 * h + 0, :D_HEAD] = bq[h * D_HEAD:(h + 1) * D_HEAD]
            buf[base + 7 + 3 * h + 1, :D_HEAD] = bq[D_MODEL + h * D_HEAD:D_MODEL + (h + 1) * D_HEAD]
            buf[base + 7 + 3 * h + 2, :D_HEAD] = bq[2 * D_MODEL + h * D_HEAD:2 * D_MODEL + (h + 1) * D_HEAD]
    buf[LNF_G_ROW, :D_MODEL] = np.asarray(params["ln_f_g"], np.float32)
    buf[LNF_B_ROW, :D_MODEL] = np.asarray(params["ln_f_b"], np.float32)
    buf[WTE_ROW:WTE_ROW + D_MODEL, :VOCAB] = np.asarray(params["wte"], np.float32).T
    return jnp.asarray(buf)


def _scalar_column(vec8):
    """Expand 8 per-matrix scalars to a (FLAT_ROWS, 1) f32 column (one dense kernel input)."""
    return jnp.take(vec8.astype(jnp.float32), jnp.asarray(ROW_PARAM_ID))[:, None]


# =============================================================================
# jitted entry points (one pallas_call each; update buffers donated -> truly in place)
# =============================================================================
@jax.jit
def _forward_fn(plastic_flat, static_buf, wte, wpe, input_ids):
    B, S = input_ids.shape
    T = B * S
    # embedding gather + positional add (XLA glue)
    x = (jnp.take(wte, input_ids, axis=0) + wpe[:S][None, :, :]).reshape(T, D_MODEL)
    x = x.astype(jnp.float32)

    logits_pad = pl.pallas_call(
        functools.partial(_fused_forward_kernel, batch=B, seq=S),
        out_shape=jax.ShapeDtypeStruct((T, LANES), jnp.float32),
        grid=(1,),
        in_specs=[_spec((T, D_MODEL)),
                  _spec((FLAT_ROWS, LANES)),
                  _spec((STATIC_ROWS, LANES))],
        out_specs=_spec((T, LANES)),
    )(x, plastic_flat, static_buf)
    return logits_pad[:, :VOCAB].reshape(B, S, VOCAB)


@functools.partial(jax.jit, static_argnames=("gamma",), donate_argnums=(0,))
def _update_traces_fn(traces_flat, grads_list, flags8, *, gamma):
    g = _pack_plastic_arrays(list(grads_list))
    fcol = _scalar_column(flags8)
    return pl.pallas_call(
        functools.partial(_trace_kernel, gamma=gamma),
        out_shape=jax.ShapeDtypeStruct((FLAT_ROWS, LANES), jnp.float32),
        grid=(1,),
        in_specs=[_spec((FLAT_ROWS, LANES)), _spec((FLAT_ROWS, LANES)), _spec((FLAT_ROWS, 1))],
        out_specs=_spec((FLAT_ROWS, LANES)),
        input_output_aliases={0: 0},
    )(traces_flat, g, fcol)


@functools.partial(jax.jit, static_argnames=("beta", "lambda_decay", "lr"), donate_argnums=(0,))
def _plastic_update_fn(params_flat, traces_flat, rewards8, *, beta, lambda_decay, lr):
    rcol = _scalar_column(rewards8)
    return pl.pallas_call(
        functools.partial(_plastic_kernel, beta=beta, lambda_decay=lambda_decay, lr=lr),
        out_shape=jax.ShapeDtypeStruct((FLAT_ROWS, LANES), jnp.float32),
        grid=(1,),
        in_specs=[_spec((FLAT_ROWS, LANES)), _spec((FLAT_ROWS, LANES)), _spec((FLAT_ROWS, 1))],
        out_specs=_spec((FLAT_ROWS, LANES)),
        input_output_aliases={0: 0},
    )(params_flat, traces_flat, rcol)


@functools.partial(jax.jit, static_argnames=("gamma", "beta", "lambda_decay", "lr"),
                   donate_argnums=(0, 1))
def _plastic_step_fn(params_flat, traces_flat, grads_list, flags8, rewards8,
                     *, gamma, beta, lambda_decay, lr):
    g = _pack_plastic_arrays(list(grads_list))
    fcol = _scalar_column(flags8)
    rcol = _scalar_column(rewards8)
    return pl.pallas_call(
        functools.partial(_step_kernel, gamma=gamma, beta=beta,
                          lambda_decay=lambda_decay, lr=lr),
        out_shape=(jax.ShapeDtypeStruct((FLAT_ROWS, LANES), jnp.float32),
                   jax.ShapeDtypeStruct((FLAT_ROWS, LANES), jnp.float32)),
        grid=(1,),
        in_specs=[_spec((FLAT_ROWS, LANES)), _spec((FLAT_ROWS, LANES)),
                  _spec((FLAT_ROWS, LANES)), _spec((FLAT_ROWS, 1)), _spec((FLAT_ROWS, 1))],
        out_specs=(_spec((FLAT_ROWS, LANES)), _spec((FLAT_ROWS, LANES))),
        input_output_aliases={0: 0, 1: 1},
    )(params_flat, traces_flat, g, fcol, rcol)


# =============================================================================
# Synthetic GPT-2-style wrapped model + NeuroPlastic wrapper
# =============================================================================
def init_params(key):
    ks = iter(jax.random.split(key, 8 + 6 * N_LAYER))

    def w(shape):
        return (0.02 * jax.random.normal(next(ks), shape)).astype(jnp.float32)

    params = {
        "wte": w((VOCAB, D_MODEL)),
        "wpe": w((MAX_SEQ, D_MODEL)),
        "ln_f_g": jnp.ones((D_MODEL,), jnp.float32),
        "ln_f_b": jnp.zeros((D_MODEL,), jnp.float32),
        "blocks": [],
    }
    for _ in range(N_LAYER):
        params["blocks"].append({
            "ln1_g": jnp.ones((D_MODEL,), jnp.float32),
            "ln1_b": jnp.zeros((D_MODEL,), jnp.float32),
            "w_qkv": w((D_MODEL, 3 * D_MODEL)),
            "b_qkv": jnp.zeros((3 * D_MODEL,), jnp.float32),
            "w_proj": w((D_MODEL, D_MODEL)),
            "b_proj": jnp.zeros((D_MODEL,), jnp.float32),
            "ln2_g": jnp.ones((D_MODEL,), jnp.float32),
            "ln2_b": jnp.zeros((D_MODEL,), jnp.float32),
            "w_fc": w((D_MODEL, D_FF)),
            "b_fc": jnp.zeros((D_FF,), jnp.float32),
            "w_out": w((D_FF, D_MODEL)),
            "b_out": jnp.zeros((D_MODEL,), jnp.float32),
        })
    return params


class NeuroPlasticWrapper:
    """JAX/Pallas port of NeuroPlasticWrapper.

    Traced ("plastic") params are the non-LN, non-embedding weight matrices (same filtering
    as the PyTorch module).  They live, together with their eligibility traces, in one
    lane-dense (768, 128) f32 buffer so trace/plastic updates are single fused kernels."""

    def __init__(self, params, gamma=GAMMA, beta=BETA, lambda_decay=LAMBDA_DECAY):
        self.gamma = float(gamma)
        self.beta = float(beta)
        self.lambda_decay = float(lambda_decay)
        self.wte = jnp.asarray(params["wte"], jnp.float32)
        self.wpe = jnp.asarray(params["wpe"], jnp.float32)
        self.static_buf = _pack_static(params)
        mats = [jnp.asarray(params["blocks"][li][n], jnp.float32) for li, n in PLASTIC_ORDER]
        self.plastic_flat = _pack_plastic_arrays(mats)
        self.traces_flat = jnp.zeros((FLAT_ROWS, LANES), jnp.float32)
        self.trace_names = list(TRACE_NAMES)

    # ---- forward = wrapped model forward (returns logits) -------------------
    def forward(self, input_ids):
        return _forward_fn(self.plastic_flat, self.static_buf, self.wte, self.wpe, input_ids)

    __call__ = forward

    # ---- helpers -------------------------------------------------------------
    def _grads_and_flags(self, grads):
        glist, flags = [], []
        for (li, name), key in zip(PLASTIC_ORDER, TRACE_NAMES):
            g = grads.get(key, None)
            if g is None:
                glist.append(jnp.zeros(PLASTIC_SHAPES[name], jnp.float32))
                flags.append(0.0)
            else:
                glist.append(jnp.asarray(g, jnp.float32))
                flags.append(1.0)
        return tuple(glist), jnp.asarray(flags, jnp.float32)

    # ---- eligibility trace update --------------------------------------------
    def update_eligibility_traces(self, grads):
        glist, flags = self._grads_and_flags(grads)
        self.traces_flat = _update_traces_fn(self.traces_flat, glist, flags, gamma=self.gamma)

    # ---- neuroplastic weight update -------------------------------------------
    def plastic_update(self, reward_signals):
        rewards = jnp.asarray(
            [float(reward_signals.get(n, 0.0)) for n in self.trace_names], jnp.float32)
        self.plastic_flat = _plastic_update_fn(
            self.plastic_flat, self.traces_flat, rewards,
            beta=self.beta, lambda_decay=self.lambda_decay, lr=PLASTICITY_LR)

    # ---- fused trace + plastic update (single pallas_call) --------------------
    def plastic_step(self, grads, reward_signals):
        glist, flags = self._grads_and_flags(grads)
        rewards = jnp.asarray(
            [float(reward_signals.get(n, 0.0)) for n in self.trace_names], jnp.float32)
        self.plastic_flat, self.traces_flat = _plastic_step_fn(
            self.plastic_flat, self.traces_flat, glist, flags, rewards,
            gamma=self.gamma, beta=self.beta, lambda_decay=self.lambda_decay, lr=PLASTICITY_LR)

    # ---- convenience accessors (unpack the flat buffers) ----------------------
    def eligibility_traces_dict(self):
        return _unpack_flat_to_dict(self.traces_flat)

    def plastic_params_dict(self):
        return _unpack_flat_to_dict(self.plastic_flat)


# =============================================================================
if __name__ == "__main__":
    key = jax.random.PRNGKey(0)
    k_params, k_ids, k_grad = jax.random.split(key, 3)

    params = init_params(k_params)
    wrapper = NeuroPlasticWrapper(params)

    # small deterministic inputs: batch=2, seq=8 token ids
    input_ids = jax.random.randint(k_ids, (2, 8), 0, VOCAB, dtype=jnp.int32)

    logits = jax.block_until_ready(wrapper.forward(input_ids))
    assert logits.shape == (2, 8, VOCAB)
    assert bool(jnp.all(jnp.isfinite(logits)))

    # synthetic gradients / rewards for the neuroplastic update kernels
    fake_grads = {
        name: 0.01 * jax.random.normal(jax.random.fold_in(k_grad, i),
                                       PLASTIC_SHAPES[name.split(".")[-1]], dtype=jnp.float32)
        for i, name in enumerate(wrapper.trace_names)
    }
    rewards = {name: 0.5 for name in wrapper.trace_names}

    # separate-kernel path (matches the PyTorch API: trace update, then plastic update)
    wrapper.update_eligibility_traces(fake_grads)
    wrapper.plastic_update(rewards)
    # fused single-kernel path (trace + plastic update in one pallas_call)
    wrapper.plastic_step(fake_grads, rewards)

    jax.block_until_ready(wrapper.plastic_flat)
    assert bool(jnp.all(jnp.isfinite(wrapper.traces_flat)))
    assert bool(jnp.all(jnp.isfinite(wrapper.plastic_flat)))

    # forward again with the plastically-updated weights (jit cache already warm)
    logits2 = jax.block_until_ready(wrapper.forward(input_ids))
    assert bool(jnp.all(jnp.isfinite(logits2)))

    print("KERNEL_OK")
</pallas_src>

<mosaic_0001>
module attributes {stable_mosaic.version = 11 : i64} {
  func.func @_fused_forward_kernel(%arg0: i32, %arg1: memref<16x32xf32, #tpu.memory_space<vmem>>, %arg2: memref<768x128xf32, #tpu.memory_space<vmem>>, %arg3: memref<64x128xf32, #tpu.memory_space<vmem>>, %arg4: memref<16x128xf32, #tpu.memory_space<vmem>>) attributes {dimension_semantics = [#tpu.dimension_semantics<arbitrary>], iteration_bounds = array<i64: 1>, scalar_prefetch = 0 : i64, scratch_operands = 0 : i64, tpu.core_type = #tpu.core_type<tc>, window_params = [{pipeline_mode = #tpu.pipeline_mode<synchronous>, transform_indices = @transform_0, window_bounds = array<i64: 16, 32>}, {pipeline_mode = #tpu.pipeline_mode<synchronous>, transform_indices = @transform_1, window_bounds = array<i64: 768, 128>}, {pipeline_mode = #tpu.pipeline_mode<synchronous>, transform_indices = @transform_2, window_bounds = array<i64: 64, 128>}, {pipeline_mode = #tpu.pipeline_mode<synchronous>, transform_indices = @transform_3, window_bounds = array<i64: 16, 128>}]} {
    %c0 = arith.constant 0 : index
    %c0_0 = arith.constant 0 : index
    %0 = vector.load %arg1[%c0, %c0_0] : memref<16x32xf32, #tpu.memory_space<vmem>>, vector<16x32xf32>
    %1 = tpu.iota {dimensions = array<i32: 0>} : vector<16x16xi32>
    %2 = tpu.iota {dimensions = array<i32: 1>} : vector<16x16xi32>
    %c3_i32 = arith.constant 3 : i32
    %3 = vector.broadcast %c3_i32 : i32 to vector<16x16xi32>
    %4 = arith.shrsi %1, %3 : vector<16x16xi32>
    %c3_i32_1 = arith.constant 3 : i32
    %5 = vector.broadcast %c3_i32_1 : i32 to vector<16x16xi32>
    %6 = arith.shrsi %2, %5 : vector<16x16xi32>
    %7 = arith.cmpi eq, %4, %6 : vector<16x16xi32>
    %c7_i32 = arith.constant 7 : i32
    %8 = vector.broadcast %c7_i32 : i32 to vector<16x16xi32>
    %9 = arith.andi %2, %8 : vector<16x16xi32>
    %c7_i32_2 = arith.constant 7 : i32
    %10 = vector.broadcast %c7_i32_2 : i32 to vector<16x16xi32>
    %11 = arith.andi %1, %10 : vector<16x16xi32>
    %12 = arith.cmpi sle, %9, %11 : vector<16x16xi32>
    %13 = arith.andi %7, %12 : vector<16x16xi1>
    %cst = arith.constant dense<0.000000e+00> : vector<16xf32>
    %14 = vector.multi_reduction <add>, %0, %cst [1] : vector<16x32xf32> to vector<16xf32>
    %15 = vector.shape_cast %14 : vector<16xf32> to vector<16x1xf32>
    %cst_3 = arith.constant 3.200000e+01 : f32
    %16 = vector.broadcast %cst_3 : f32 to vector<16x1xf32>
    %17 = arith.divf %15, %16 : vector<16x1xf32>
    %18 = vector.broadcast %17 : vector<16x1xf32> to vector<16x32xf32>
    %19 = arith.subf %0, %18 : vector<16x32xf32>
    %20 = arith.mulf %19, %19 : vector<16x32xf32>
    %cst_4 = arith.constant dense<0.000000e+00> : vector<16xf32>
    %21 = vector.multi_reduction <add>, %20, %cst_4 [1] : vector<16x32xf32> to vector<16xf32>
    %22 = vector.shape_cast %21 : vector<16xf32> to vector<16x1xf32>
    %cst_5 = arith.constant 3.200000e+01 : f32
    %23 = vector.broadcast %cst_5 : f32 to vector<16x1xf32>
    %24 = arith.divf %22, %23 : vector<16x1xf32>
    %25 = vector.broadcast %17 : vector<16x1xf32> to vector<16x32xf32>
    %26 = arith.subf %0, %25 : vector<16x32xf32>
    %cst_6 = arith.constant 9.99999974E-6 : f32
    %27 = vector.broadcast %cst_6 : f32 to vector<16x1xf32>
    %28 = arith.addf %24, %27 : vector<16x1xf32>
    %29 = math.rsqrt %28 : vector<16x1xf32>
    %30 = vector.broadcast %29 : vector<16x1xf32> to vector<16x32xf32>
    %31 = arith.mulf %26, %30 : vector<16x32xf32>
    %c0_7 = arith.constant 0 : index
    %c0_8 = arith.constant 0 : index
    %32 = vector.load %arg3[%c0_7, %c0_8] : memref<64x128xf32, #tpu.memory_space<vmem>>, vector<1x32xf32>
    %33 = vector.broadcast %32 : vector<1x32xf32> to vector<16x32xf32>
    %34 = arith.mulf %31, %33 : vector<16x32xf32>
    %c1 = arith.constant 1 : index
    %c0_9 = arith.constant 0 : index
    %35 = vector.load %arg3[%c1, %c0_9] : memref<64x128xf32, #tpu.memory_space<vmem>>, vector<1x32xf32>
    %36 = vector.broadcast %35 : vector<1x32xf32> to vector<16x32xf32>
    %37 = arith.addf %34, %36 : vector<16x32xf32>
    %38 = arith.truncf %37 : vector<16x32xf32> to vector<16x32xbf16>
    %cst_10 = arith.constant 0.000000e+00 : f32
    %39 = vector.broadcast %cst_10 : f32 to vector<16x32xf32>
    %c0_11 = arith.constant 0 : index
    %c0_12 = arith.constant 0 : index
    %40 = vector.load %arg2[%c0_11, %c0_12] : memref<768x128xf32, #tpu.memory_space<vmem>>, vector<32x16xf32>
    %41 = arith.truncf %40 : vector<32x16xf32> to vector<32x16xbf16>
    %cst_13 = arith.constant dense<0.000000e+00> : vector<16x16xf32>
    %42 = tpu.matmul %38, %41, %cst_13 {dimension_numbers = #tpu.dot_dimension_numbers<[1], [0], [0], [1], [0, 0, 1, 1], [], []>} : vector<16x32xbf16>, vector<32x16xbf16>, vector<16x16xf32> -> vector<16x16xf32>
    %c7 = arith.constant 7 : index
    %c0_14 = arith.constant 0 : index
    %43 = vector.load %arg3[%c7, %c0_14] : memref<64x128xf32, #tpu.memory_space<vmem>>, vector<1x16xf32>
    %44 = vector.broadcast %43 : vector<1x16xf32> to vector<16x16xf32>
    %45 = arith.addf %42, %44 : vector<16x16xf32>
    %c32 = arith.constant 32 : index
    %c0_15 = arith.constant 0 : index
    %46 = vector.load %arg2[%c32, %c0_15] : memref<768x128xf32, #tpu.memory_space<vmem>>, vector<32x16xf32>
    %47 = arith.truncf %46 : vector<32x16xf32> to vector<32x16xbf16>
    %cst_16 = arith.constant dense<0.000000e+00> : vector<16x16xf32>
    %48 = tpu.matmul %38, %47, %cst_16 {dimension_numbers = #tpu.dot_dimension_numbers<[1], [0], [0], [1], [0, 0, 1, 1], [], []>} : vector<16x32xbf16>, vector<32x16xbf16>, vector<16x16xf32> -> vector<16x16xf32>
    %c8 = arith.constant 8 : index
    %c0_17 = arith.constant 0 : index
    %49 = vector.load %arg3[%c8, %c0_17] : memref<64x128xf32, #tpu.memory_space<vmem>>, vector<1x16xf32>
    %50 = vector.broadcast %49 : vector<1x16xf32> to vector<16x16xf32>
    %51 = arith.addf %48, %50 : vector<16x16xf32>
    %c64 = arith.constant 64 : index
    %c0_18 = arith.constant 0 : index
    %52 = vector.load %arg2[%c64, %c0_18] : memref<768x128xf32, #tpu.memory_space<vmem>>, vector<32x16xf32>
    %53 = arith.truncf %52 : vector<32x16xf32> to vector<32x16xbf16>
    %cst_19 = arith.constant dense<0.000000e+00> : vector<16x16xf32>
    %54 = tpu.matmul %38, %53, %cst_19 {dimension_numbers = #tpu.dot_dimension_numbers<[1], [0], [0], [1], [0, 0, 1, 1], [], []>} : vector<16x32xbf16>, vector<32x16xbf16>, vector<16x16xf32> -> vector<16x16xf32>
    %c9 = arith.constant 9 : index
    %c0_20 = arith.constant 0 : index
    %55 = vector.load %arg3[%c9, %c0_20] : memref<64x128xf32, #tpu.memory_space<vmem>>, vector<1x16xf32>
    %56 = vector.broadcast %55 : vector<1x16xf32> to vector<16x16xf32>
    %57 = arith.addf %54, %56 : vector<16x16xf32>
    %58 = arith.truncf %45 : vector<16x16xf32> to vector<16x16xbf16>
    %59 = arith.truncf %51 : vector<16x16xf32> to vector<16x16xbf16>
    %cst_21 = arith.constant dense<0.000000e+00> : vector<16x16xf32>
    %60 = tpu.matmul %58, %59, %cst_21 {dimension_numbers = #tpu.dot_dimension_numbers<[1], [1], [0], [0], [0, 0, 1, 0], [], []>} : vector<16x16xbf16>, vector<16x16xbf16>, vector<16x16xf32> -> vector<16x16xf32>
    %cst_22 = arith.constant 2.500000e-01 : f32
    %61 = vector.broadcast %cst_22 : f32 to vector<16x16xf32>
    %62 = arith.mulf %60, %61 : vector<16x16xf32>
    %cst_23 = arith.constant -1.000000e+30 : f32
    %63 = vector.broadcast %cst_23 : f32 to vector<16x16xf32>
    %64 = arith.select %13, %62, %63 : vector<16x16xi1>, vector<16x16xf32>
    %cst_24 = arith.constant dense<0xFF800000> : vector<16xf32>
    %65 = vector.multi_reduction <maximumf>, %64, %cst_24 [1] : vector<16x16xf32> to vector<16xf32>
    %66 = vector.shape_cast %65 : vector<16xf32> to vector<16x1xf32>
    %67 = vector.broadcast %66 : vector<16x1xf32> to vector<16x16xf32>
    %68 = arith.subf %64, %67 : vector<16x16xf32>
    %69 = math.exp %68 : vector<16x16xf32>
    %cst_25 = arith.constant dense<0.000000e+00> : vector<16xf32>
    %70 = vector.multi_reduction <add>, %69, %cst_25 [1] : vector<16x16xf32> to vector<16xf32>
    %71 = vector.shape_cast %70 : vector<16xf32> to vector<16x1xf32>
    %72 = tpu.reciprocal %71 {approx = true} : vector<16x1xf32> -> vector<16x1xf32>
    %73 = vector.broadcast %72 : vector<16x1xf32> to vector<16x16xf32>
    %74 = arith.mulf %69, %73 : vector<16x16xf32>
    %75 = arith.truncf %74 : vector<16x16xf32> to vector<16x16xbf16>
    %76 = arith.truncf %57 : vector<16x16xf32> to vector<16x16xbf16>
    %cst_26 = arith.constant dense<0.000000e+00> : vector<16x16xf32>
    %77 = tpu.matmul %75, %76, %cst_26 {dimension_numbers = #tpu.dot_dimension_numbers<[1], [0], [0], [1], [0, 0, 1, 1], [], []>} : vector<16x16xbf16>, vector<16x16xbf16>, vector<16x16xf32> -> vector<16x16xf32>
    %c192 = arith.constant 192 : index
    %c0_27 = arith.constant 0 : index
    %78 = vector.load %arg2[%c192, %c0_27] : memref<768x128xf32, #tpu.memory_space<vmem>>, vector<16x32xf32>
    %79 = arith.truncf %78 : vector<16x32xf32> to vector<16x32xbf16>
    %80 = arith.truncf %77 : vector<16x16xf32> to vector<16x16xbf16>
    %cst_28 = arith.constant dense<0.000000e+00> : vector<16x32xf32>
    %81 = tpu.matmul %80, %79, %cst_28 {dimension_numbers = #tpu.dot_dimension_numbers<[1], [0], [0], [1], [0, 0, 1, 1], [], []>} : vector<16x16xbf16>, vector<16x32xbf16>, vector<16x32xf32> -> vector<16x32xf32>
    %82 = arith.addf %39, %81 : vector<16x32xf32>
    %c96 = arith.constant 96 : index
    %c0_29 = arith.constant 0 : index
    %83 = vector.load %arg2[%c96, %c0_29] : memref<768x128xf32, #tpu.memory_space<vmem>>, vector<32x16xf32>
    %84 = arith.truncf %83 : vector<32x16xf32> to vector<32x16xbf16>
    %cst_30 = arith.constant dense<0.000000e+00> : vector<16x16xf32>
    %85 = tpu.matmul %38, %84, %cst_30 {dimension_numbers = #tpu.dot_dimension_numbers<[1], [0], [0], [1], [0, 0, 1, 1], [], []>} : vector<16x32xbf16>, vector<32x16xbf16>, vector<16x16xf32> -> vector<16x16xf32>
    %c10 = arith.constant 10 : index
    %c0_31 = arith.constant 0 : index
    %86 = vector.load %arg3[%c10, %c0_31] : memref<64x128xf32, #tpu.memory_space<vmem>>, vector<1x16xf32>
    %87 = vector.broadcast %86 : vector<1x16xf32> to vector<16x16xf32>
    %88 = arith.addf %85, %87 : vector<16x16xf32>
    %c128 = arith.constant 128 : index
    %c0_32 = arith.constant 0 : index
    %89 = vector.load %arg2[%c128, %c0_32] : memref<768x128xf32, #tpu.memory_space<vmem>>, vector<32x16xf32>
    %90 = arith.truncf %89 : vector<32x16xf32> to vector<32x16xbf16>
    %cst_33 = arith.constant dense<0.000000e+00> : vector<16x16xf32>
    %91 = tpu.matmul %38, %90, %cst_33 {dimension_numbers = #tpu.dot_dimension_numbers<[1], [0], [0], [1], [0, 0, 1, 1], [], []>} : vector<16x32xbf16>, vector<32x16xbf16>, vector<16x16xf32> -> vector<16x16xf32>
    %c11 = arith.constant 11 : index
    %c0_34 = arith.constant 0 : index
    %92 = vector.load %arg3[%c11, %c0_34] : memref<64x128xf32, #tpu.memory_space<vmem>>, vector<1x16xf32>
    %93 = vector.broadcast %92 : vector<1x16xf32> to vector<16x16xf32>
    %94 = arith.addf %91, %93 : vector<16x16xf32>
    %c160 = arith.constant 160 : index
    %c0_35 = arith.constant 0 : index
    %95 = vector.load %arg2[%c160, %c0_35] : memref<768x128xf32, #tpu.memory_space<vmem>>, vector<32x16xf32>
    %96 = arith.truncf %95 : vector<32x16xf32> to vector<32x16xbf16>
    %cst_36 = arith.constant dense<0.000000e+00> : vector<16x16xf32>
    %97 = tpu.matmul %38, %96, %cst_36 {dimension_numbers = #tpu.dot_dimension_numbers<[1], [0], [0], [1], [0, 0, 1, 1], [], []>} : vector<16x32xbf16>, vector<32x16xbf16>, vector<16x16xf32> -> vector<16x16xf32>
    %c12 = arith.constant 12 : index
    %c0_37 = arith.constant 0 : index
    %98 = vector.load %arg3[%c12, %c0_37] : memref<64x128xf32, #tpu.memory_space<vmem>>, vector<1x16xf32>
    %99 = vector.broadcast %98 : vector<1x16xf32> to vector<16x16xf32>
    %100 = arith.addf %97, %99 : vector<16x16xf32>
    %101 = arith.truncf %88 : vector<16x16xf32> to vector<16x16xbf16>
    %102 = arith.truncf %94 : vector<16x16xf32> to vector<16x16xbf16>
    %cst_38 = arith.constant dense<0.000000e+00> : vector<16x16xf32>
    %103 = tpu.matmul %101, %102, %cst_38 {dimension_numbers = #tpu.dot_dimension_numbers<[1], [1], [0], [0], [0, 0, 1, 0], [], []>} : vector<16x16xbf16>, vector<16x16xbf16>, vector<16x16xf32> -> vector<16x16xf32>
    %cst_39 = arith.constant 2.500000e-01 : f32
    %104 = vector.broadcast %cst_39 : f32 to vector<16x16xf32>
    %105 = arith.mulf %103, %104 : vector<16x16xf32>
    %cst_40 = arith.constant -1.000000e+30 : f32
    %106 = vector.broadcast %cst_40 : f32 to vector<16x16xf32>
    %107 = arith.select %13, %105, %106 : vector<16x16xi1>, vector<16x16xf32>
    %cst_41 = arith.constant dense<0xFF800000> : vector<16xf32>
    %108 = vector.multi_reduction <maximumf>, %107, %cst_41 [1] : vector<16x16xf32> to vector<16xf32>
    %109 = vector.shape_cast %108 : vector<16xf32> to vector<16x1xf32>
    %110 = vector.broadcast %109 : vector<16x1xf32> to vector<16x16xf32>
    %111 = arith.subf %107, %110 : vector<16x16xf32>
    %112 = math.exp %111 : vector<16x16xf32>
    %cst_42 = arith.constant dense<0.000000e+00> : vector<16xf32>
    %113 = vector.multi_reduction <add>, %112, %cst_42 [1] : vector<16x16xf32> to vector<16xf32>
    %114 = vector.shape_cast %113 : vector<16xf32> to vector<16x1xf32>
    %115 = tpu.reciprocal %114 {approx = true} : vector<16x1xf32> -> vector<16x1xf32>
    %116 = vector.broadcast %115 : vector<16x1xf32> to vector<16x16xf32>
    %117 = arith.mulf %112, %116 : vector<16x16xf32>
    %118 = arith.truncf %117 : vector<16x16xf32> to vector<16x16xbf16>
    %119 = arith.truncf %100 : vector<16x16xf32> to vector<16x16xbf16>
    %cst_43 = arith.constant dense<0.000000e+00> : vector<16x16xf32>
    %120 = tpu.matmul %118, %119, %cst_43 {dimension_numbers = #tpu.dot_dimension_numbers<[1], [0], [0], [1], [0, 0, 1, 1], [], []>} : vector<16x16xbf16>, vector<16x16xbf16>, vector<16x16xf32> -> vector<16x16xf32>
    %c208 = arith.constant 208 : index
    %c0_44 = arith.constant 0 : index
    %121 = vector.load %arg2[%c208, %c0_44] : memref<768x128xf32, #tpu.memory_space<vmem>>, vector<16x32xf32>
    %122 = arith.truncf %121 : vector<16x32xf32> to vector<16x32xbf16>
    %123 = arith.truncf %120 : vector<16x16xf32> to vector<16x16xbf16>
    %cst_45 = arith.constant dense<0.000000e+00> : vector<16x32xf32>
    %124 = tpu.matmul %123, %122, %cst_45 {dimension_numbers = #tpu.dot_dimension_numbers<[1], [0], [0], [1], [0, 0, 1, 1], [], []>} : vector<16x16xbf16>, vector<16x32xbf16>, vector<16x32xf32> -> vector<16x32xf32>
    %125 = arith.addf %82, %124 : vector<16x32xf32>
    %126 = arith.addf %0, %125 : vector<16x32xf32>
    %c4 = arith.constant 4 : index
    %c0_46 = arith.constant 0 : index
    %127 = vector.load %arg3[%c4, %c0_46] : memref<64x128xf32, #tpu.memory_space<vmem>>, vector<1x32xf32>
    %128 = vector.broadcast %127 : vector<1x32xf32> to vector<16x32xf32>
    %129 = arith.addf %126, %128 : vector<16x32xf32>
    %cst_47 = arith.constant dense<0.000000e+00> : vector<16xf32>
    %130 = vector.multi_reduction <add>, %129, %cst_47 [1] : vector<16x32xf32> to vector<16xf32>
    %131 = vector.shape_cast %130 : vector<16xf32> to vector<16x1xf32>
    %cst_48 = arith.constant 3.200000e+01 : f32
    %132 = vector.broadcast %cst_48 : f32 to vector<16x1xf32>
    %133 = arith.divf %131, %132 : vector<16x1xf32>
    %134 = vector.broadcast %133 : vector<16x1xf32> to vector<16x32xf32>
    %135 = arith.subf %129, %134 : vector<16x32xf32>
    %136 = arith.mulf %135, %135 : vector<16x32xf32>
    %cst_49 = arith.constant dense<0.000000e+00> : vector<16xf32>
    %137 = vector.multi_reduction <add>, %136, %cst_49 [1] : vector<16x32xf32> to vector<16xf32>
    %138 = vector.shape_cast %137 : vector<16xf32> to vector<16x1xf32>
    %cst_50 = arith.constant 3.200000e+01 : f32
    %139 = vector.broadcast %cst_50 : f32 to vector<16x1xf32>
    %140 = arith.divf %138, %139 : vector<16x1xf32>
    %141 = vector.broadcast %133 : vector<16x1xf32> to vector<16x32xf32>
    %142 = arith.subf %129, %141 : vector<16x32xf32>
    %cst_51 = arith.constant 9.99999974E-6 : f32
    %143 = vector.broadcast %cst_51 : f32 to vector<16x1xf32>
    %144 = arith.addf %140, %143 : vector<16x1xf32>
    %145 = math.rsqrt %144 : vector<16x1xf32>
    %146 = vector.broadcast %145 : vector<16x1xf32> to vector<16x32xf32>
    %147 = arith.mulf %142, %146 : vector<16x32xf32>
    %c2 = arith.constant 2 : index
    %c0_52 = arith.constant 0 : index
    %148 = vector.load %arg3[%c2, %c0_52] : memref<64x128xf32, #tpu.memory_space<vmem>>, vector<1x32xf32>
    %149 = vector.broadcast %148 : vector<1x32xf32> to vector<16x32xf32>
    %150 = arith.mulf %147, %149 : vector<16x32xf32>
    %c3 = arith.constant 3 : index
    %c0_53 = arith.constant 0 : index
    %151 = vector.load %arg3[%c3, %c0_53] : memref<64x128xf32, #tpu.memory_space<vmem>>, vector<1x32xf32>
    %152 = vector.broadcast %151 : vector<1x32xf32> to vector<16x32xf32>
    %153 = arith.addf %150, %152 : vector<16x32xf32>
    %154 = arith.truncf %153 : vector<16x32xf32> to vector<16x32xbf16>
    %c224 = arith.constant 224 : index
    %c0_54 = arith.constant 0 : index
    %155 = vector.load %arg2[%c224, %c0_54] : memref<768x128xf32, #tpu.memory_space<vmem>>, vector<32x128xf32>
    %156 = arith.truncf %155 : vector<32x128xf32> to vector<32x128xbf16>
    %cst_55 = arith.constant dense<0.000000e+00> : vector<16x128xf32>
    %157 = tpu.matmul %154, %156, %cst_55 {dimension_numbers = #tpu.dot_dimension_numbers<[1], [0], [0], [1], [0, 0, 1, 1], [], []>} : vector<16x32xbf16>, vector<32x128xbf16>, vector<16x128xf32> -> vector<16x128xf32>
    %c5 = arith.constant 5 : index
    %c0_56 = arith.constant 0 : index
    %158 = vector.load %arg3[%c5, %c0_56] : memref<64x128xf32, #tpu.memory_space<vmem>>, vector<1x128xf32>
    %159 = vector.broadcast %158 : vector<1x128xf32> to vector<16x128xf32>
    %160 = arith.addf %157, %159 : vector<16x128xf32>
    %cst_57 = arith.constant 5.000000e-01 : f32
    %161 = vector.broadcast %cst_57 : f32 to vector<16x128xf32>
    %162 = arith.mulf %161, %160 : vector<16x128xf32>
    %cst_58 = arith.constant 4.471500e-02 : f32
    %163 = vector.broadcast %cst_58 : f32 to vector<16x128xf32>
    %164 = arith.mulf %163, %160 : vector<16x128xf32>
    %165 = arith.mulf %164, %160 : vector<16x128xf32>
    %166 = arith.mulf %165, %160 : vector<16x128xf32>
    %167 = arith.addf %160, %166 : vector<16x128xf32>
    %cst_59 = arith.constant 0.797884583 : f32
    %168 = vector.broadcast %cst_59 : f32 to vector<16x128xf32>
    %169 = arith.mulf %168, %167 : vector<16x128xf32>
    %170 = math.tanh %169 : vector<16x128xf32>
    %cst_60 = arith.constant 1.000000e+00 : f32
    %171 = vector.broadcast %cst_60 : f32 to vector<16x128xf32>
    %172 = arith.addf %171, %170 : vector<16x128xf32>
    %173 = arith.mulf %162, %172 : vector<16x128xf32>
    %174 = arith.truncf %173 : vector<16x128xf32> to vector<16x128xbf16>
    %c256 = arith.constant 256 : index
    %c0_61 = arith.constant 0 : index
    %175 = vector.load %arg2[%c256, %c0_61] : memref<768x128xf32, #tpu.memory_space<vmem>>, vector<128x32xf32>
    %176 = arith.truncf %175 : vector<128x32xf32> to vector<128x32xbf16>
    %cst_62 = arith.constant dense<0.000000e+00> : vector<16x32xf32>
    %177 = tpu.matmul %174, %176, %cst_62 {dimension_numbers = #tpu.dot_dimension_numbers<[1], [0], [0], [1], [0, 0, 1, 1], [], []>} : vector<16x128xbf16>, vector<128x32xbf16>, vector<16x32xf32> -> vector<16x32xf32>
    %178 = arith.addf %129, %177 : vector<16x32xf32>
    %c6 = arith.constant 6 : index
    %c0_63 = arith.constant 0 : index
    %179 = vector.load %arg3[%c6, %c0_63] : memref<64x128xf32, #tpu.memory_space<vmem>>, vector<1x32xf32>
    %180 = vector.broadcast %179 : vector<1x32xf32> to vector<16x32xf32>
    %181 = arith.addf %178, %180 : vector<16x32xf32>
    %cst_64 = arith.constant dense<0.000000e+00> : vector<16xf32>
    %182 = vector.multi_reduction <add>, %181, %cst_64 [1] : vector<16x32xf32> to vector<16xf32>
    %183 = vector.shape_cast %182 : vector<16xf32> to vector<16x1xf32>
    %cst_65 = arith.constant 3.200000e+01 : f32
    %184 = vector.broadcast %cst_65 : f32 to vector<16x1xf32>
    %185 = arith.divf %183, %184 : vector<16x1xf32>
    %186 = vector.broadcast %185 : vector<16x1xf32> to vector<16x32xf32>
    %187 = arith.subf %181, %186 : vector<16x32xf32>
    %188 = arith.mulf %187, %187 : vector<16x32xf32>
    %cst_66 = arith.constant dense<0.000000e+00> : vector<16xf32>
    %189 = vector.multi_reduction <add>, %188, %cst_66 [1] : vector<16x32xf32> to vector<16xf32>
    %190 = vector.shape_cast %189 : vector<16xf32> to vector<16x1xf32>
    %cst_67 = arith.constant 3.200000e+01 : f32
    %191 = vector.broadcast %cst_67 : f32 to vector<16x1xf32>
    %192 = arith.divf %190, %191 : vector<16x1xf32>
    %193 = vector.broadcast %185 : vector<16x1xf32> to vector<16x32xf32>
    %194 = arith.subf %181, %193 : vector<16x32xf32>
    %cst_68 = arith.constant 9.99999974E-6 : f32
    %195 = vector.broadcast %cst_68 : f32 to vector<16x1xf32>
    %196 = arith.addf %192, %195 : vector<16x1xf32>
    %197 = math.rsqrt %196 : vector<16x1xf32>
    %198 = vector.broadcast %197 : vector<16x1xf32> to vector<16x32xf32>
    %199 = arith.mulf %194, %198 : vector<16x32xf32>
    %c13 = arith.constant 13 : index
    %c0_69 = arith.constant 0 : index
    %200 = vector.load %arg3[%c13, %c0_69] : memref<64x128xf32, #tpu.memory_space<vmem>>, vector<1x32xf32>
    %201 = vector.broadcast %200 : vector<1x32xf32> to vector<16x32xf32>
    %202 = arith.mulf %199, %201 : vector<16x32xf32>
    %c14 = arith.constant 14 : index
    %c0_70 = arith.constant 0 : index
    %203 = vector.load %arg3[%c14, %c0_70] : memref<64x128xf32, #tpu.memory_space<vmem>>, vector<1x32xf32>
    %204 = vector.broadcast %203 : vector<1x32xf32> to vector<16x32xf32>
    %205 = arith.addf %202, %204 : vector<16x32xf32>
    %206 = arith.truncf %205 : vector<16x32xf32> to vector<16x32xbf16>
    %cst_71 = arith.constant 0.000000e+00 : f32
    %207 = vector.broadcast %cst_71 : f32 to vector<16x32xf32>
    %c384 = arith.constant 384 : index
    %c0_72 = arith.constant 0 : index
    %208 = vector.load %arg2[%c384, %c0_72] : memref<768x128xf32, #tpu.memory_space<vmem>>, vector<32x16xf32>
    %209 = arith.truncf %208 : vector<32x16xf32> to vector<32x16xbf16>
    %cst_73 = arith.constant dense<0.000000e+00> : vector<16x16xf32>
    %210 = tpu.matmul %206, %209, %cst_73 {dimension_numbers = #tpu.dot_dimension_numbers<[1], [0], [0], [1], [0, 0, 1, 1], [], []>} : vector<16x32xbf16>, vector<32x16xbf16>, vector<16x16xf32> -> vector<16x16xf32>
    %c20 = arith.constant 20 : index
    %c0_74 = arith.constant 0 : index
    %211 = vector.load %arg3[%c20, %c0_74] : memref<64x128xf32, #tpu.memory_space<vmem>>, vector<1x16xf32>
    %212 = vector.broadcast %211 : vector<1x16xf32> to vector<16x16xf32>
    %213 = arith.addf %210, %212 : vector<16x16xf32>
    %c416 = arith.constant 416 : index
    %c0_75 = arith.constant 0 : index
    %214 = vector.load %arg2[%c416, %c0_75] : memref<768x128xf32, #tpu.memory_space<vmem>>, vector<32x16xf32>
    %215 = arith.truncf %214 : vector<32x16xf32> to vector<32x16xbf16>
    %cst_76 = arith.constant dense<0.000000e+00> : vector<16x16xf32>
    %216 = tpu.matmul %206, %215, %cst_76 {dimension_numbers = #tpu.dot_dimension_numbers<[1], [0], [0], [1], [0, 0, 1, 1], [], []>} : vector<16x32xbf16>, vector<32x16xbf16>, vector<16x16xf32> -> vector<16x16xf32>
    %c21 = arith.constant 21 : index
    %c0_77 = arith.constant 0 : index
    %217 = vector.load %arg3[%c21, %c0_77] : memref<64x128xf32, #tpu.memory_space<vmem>>, vector<1x16xf32>
    %218 = vector.broadcast %217 : vector<1x16xf32> to vector<16x16xf32>
    %219 = arith.addf %216, %218 : vector<16x16xf32>
    %c448 = arith.constant 448 : index
    %c0_78 = arith.constant 0 : index
    %220 = vector.load %arg2[%c448, %c0_78] : memref<768x128xf32, #tpu.memory_space<vmem>>, vector<32x16xf32>
    %221 = arith.truncf %220 : vector<32x16xf32> to vector<32x16xbf16>
    %cst_79 = arith.constant dense<0.000000e+00> : vector<16x16xf32>
    %222 = tpu.matmul %206, %221, %cst_79 {dimension_numbers = #tpu.dot_dimension_numbers<[1], [0], [0], [1], [0, 0, 1, 1], [], []>} : vector<16x32xbf16>, vector<32x16xbf16>, vector<16x16xf32> -> vector<16x16xf32>
    %c22 = arith.constant 22 : index
    %c0_80 = arith.constant 0 : index
    %223 = vector.load %arg3[%c22, %c0_80] : memref<64x128xf32, #tpu.memory_space<vmem>>, vector<1x16xf32>
    %224 = vector.broadcast %223 : vector<1x16xf32> to vector<16x16xf32>
    %225 = arith.addf %222, %224 : vector<16x16xf32>
    %226 = arith.truncf %213 : vector<16x16xf32> to vector<16x16xbf16>
    %227 = arith.truncf %219 : vector<16x16xf32> to vector<16x16xbf16>
    %cst_81 = arith.constant dense<0.000000e+00> : vector<16x16xf32>
    %228 = tpu.matmul %226, %227, %cst_81 {dimension_numbers = #tpu.dot_dimension_numbers<[1], [1], [0], [0], [0, 0, 1, 0], [], []>} : vector<16x16xbf16>, vector<16x16xbf16>, vector<16x16xf32> -> vector<16x16xf32>
    %cst_82 = arith.constant 2.500000e-01 : f32
    %229 = vector.broadcast %cst_82 : f32 to vector<16x16xf32>
    %230 = arith.mulf %228, %229 : vector<16x16xf32>
    %cst_83 = arith.constant -1.000000e+30 : f32
    %231 = vector.broadcast %cst_83 : f32 to vector<16x16xf32>
    %232 = arith.select %13, %230, %231 : vector<16x16xi1>, vector<16x16xf32>
    %cst_84 = arith.constant dense<0xFF800000> : vector<16xf32>
    %233 = vector.multi_reduction <maximumf>, %232, %cst_84 [1] : vector<16x16xf32> to vector<16xf32>
    %234 = vector.shape_cast %233 : vector<16xf32> to vector<16x1xf32>
    %235 = vector.broadcast %234 : vector<16x1xf32> to vector<16x16xf32>
    %236 = arith.subf %232, %235 : vector<16x16xf32>
    %237 = math.exp %236 : vector<16x16xf32>
    %cst_85 = arith.constant dense<0.000000e+00> : vector<16xf32>
    %238 = vector.multi_reduction <add>, %237, %cst_85 [1] : vector<16x16xf32> to vector<16xf32>
    %239 = vector.shape_cast %238 : vector<16xf32> to vector<16x1xf32>
    %240 = tpu.reciprocal %239 {approx = true} : vector<16x1xf32> -> vector<16x1xf32>
    %241 = vector.broadcast %240 : vector<16x1xf32> to vector<16x16xf32>
    %242 = arith.mulf %237, %241 : vector<16x16xf32>
    %243 = arith.truncf %242 : vector<16x16xf32> to vector<16x16xbf16>
    %244 = arith.truncf %225 : vector<16x16xf32> to vector<16x16xbf16>
    %cst_86 = arith.constant dense<0.000000e+00> : vector<16x16xf32>
    %245 = tpu.matmul %243, %244, %cst_86 {dimension_numbers = #tpu.dot_dimension_numbers<[1], [0], [0], [1], [0, 0, 1, 1], [], []>} : vector<16x16xbf16>, vector<16x16xbf16>, vector<16x16xf32> -> vector<16x16xf32>
    %c576 = arith.constant 576 : index
    %c0_87 = arith.constant 0 : index
    %246 = vector.load %arg2[%c576, %c0_87] : memref<768x128xf32, #tpu.memory_space<vmem>>, vector<16x32xf32>
    %247 = arith.truncf %246 : vector<16x32xf32> to vector<16x32xbf16>
    %248 = arith.truncf %245 : vector<16x16xf32> to vector<16x16xbf16>
    %cst_88 = arith.constant dense<0.000000e+00> : vector<16x32xf32>
    %249 = tpu.matmul %248, %247, %cst_88 {dimension_numbers = #tpu.dot_dimension_numbers<[1], [0], [0], [1], [0, 0, 1, 1], [], []>} : vector<16x16xbf16>, vector<16x32xbf16>, vector<16x32xf32> -> vector<16x32xf32>
    %250 = arith.addf %207, %249 : vector<16x32xf32>
    %c480 = arith.constant 480 : index
    %c0_89 = arith.constant 0 : index
    %251 = vector.load %arg2[%c480, %c0_89] : memref<768x128xf32, #tpu.memory_space<vmem>>, vector<32x16xf32>
    %252 = arith.truncf %251 : vector<32x16xf32> to vector<32x16xbf16>
    %cst_90 = arith.constant dense<0.000000e+00> : vector<16x16xf32>
    %253 = tpu.matmul %206, %252, %cst_90 {dimension_numbers = #tpu.dot_dimension_numbers<[1], [0], [0], [1], [0, 0, 1, 1], [], []>} : vector<16x32xbf16>, vector<32x16xbf16>, vector<16x16xf32> -> vector<16x16xf32>
    %c23 = arith.constant 23 : index
    %c0_91 = arith.constant 0 : index
    %254 = vector.load %arg3[%c23, %c0_91] : memref<64x128xf32, #tpu.memory_space<vmem>>, vector<1x16xf32>
    %255 = vector.broadcast %254 : vector<1x16xf32> to vector<16x16xf32>
    %256 = arith.addf %253, %255 : vector<16x16xf32>
    %c512 = arith.constant 512 : index
    %c0_92 = arith.constant 0 : index
    %257 = vector.load %arg2[%c512, %c0_92] : memref<768x128xf32, #tpu.memory_space<vmem>>, vector<32x16xf32>
    %258 = arith.truncf %257 : vector<32x16xf32> to vector<32x16xbf16>
    %cst_93 = arith.constant dense<0.000000e+00> : vector<16x16xf32>
    %259 = tpu.matmul %206, %258, %cst_93 {dimension_numbers = #tpu.dot_dimension_numbers<[1], [0], [0], [1], [0, 0, 1, 1], [], []>} : vector<16x32xbf16>, vector<32x16xbf16>, vector<16x16xf32> -> vector<16x16xf32>
    %c24 = arith.constant 24 : index
    %c0_94 = arith.constant 0 : index
    %260 = vector.load %arg3[%c24, %c0_94] : memref<64x128xf32, #tpu.memory_space<vmem>>, vector<1x16xf32>
    %261 = vector.broadcast %260 : vector<1x16xf32> to vector<16x16xf32>
    %262 = arith.addf %259, %261 : vector<16x16xf32>
    %c544 = arith.constant 544 : index
    %c0_95 = arith.constant 0 : index
    %263 = vector.load %arg2[%c544, %c0_95] : memref<768x128xf32, #tpu.memory_space<vmem>>, vector<32x16xf32>
    %264 = arith.truncf %263 : vector<32x16xf32> to vector<32x16xbf16>
    %cst_96 = arith.constant dense<0.000000e+00> : vector<16x16xf32>
    %265 = tpu.matmul %206, %264, %cst_96 {dimension_numbers = #tpu.dot_dimension_numbers<[1], [0], [0], [1], [0, 0, 1, 1], [], []>} : vector<16x32xbf16>, vector<32x16xbf16>, vector<16x16xf32> -> vector<16x16xf32>
    %c25 = arith.constant 25 : index
    %c0_97 = arith.constant 0 : index
    %266 = vector.load %arg3[%c25, %c0_97] : memref<64x128xf32, #tpu.memory_space<vmem>>, vector<1x16xf32>
    %267 = vector.broadcast %266 : vector<1x16xf32> to vector<16x16xf32>
    %268 = arith.addf %265, %267 : vector<16x16xf32>
    %269 = arith.truncf %256 : vector<16x16xf32> to vector<16x16xbf16>
    %270 = arith.truncf %262 : vector<16x16xf32> to vector<16x16xbf16>
    %cst_98 = arith.constant dense<0.000000e+00> : vector<16x16xf32>
    %271 = tpu.matmul %269, %270, %cst_98 {dimension_numbers = #tpu.dot_dimension_numbers<[1], [1], [0], [0], [0, 0, 1, 0], [], []>} : vector<16x16xbf16>, vector<16x16xbf16>, vector<16x16xf32> -> vector<16x16xf32>
    %cst_99 = arith.constant 2.500000e-01 : f32
    %272 = vector.broadcast %cst_99 : f32 to vector<16x16xf32>
    %273 = arith.mulf %271, %272 : vector<16x16xf32>
    %cst_100 = arith.constant -1.000000e+30 : f32
    %274 = vector.broadcast %cst_100 : f32 to vector<16x16xf32>
    %275 = arith.select %13, %273, %274 : vector<16x16xi1>, vector<16x16xf32>
    %cst_101 = arith.constant dense<0xFF800000> : vector<16xf32>
    %276 = vector.multi_reduction <maximumf>, %275, %cst_101 [1] : vector<16x16xf32> to vector<16xf32>
    %277 = vector.shape_cast %276 : vector<16xf32> to vector<16x1xf32>
    %278 = vector.broadcast %277 : vector<16x1xf32> to vector<16x16xf32>
    %279 = arith.subf %275, %278 : vector<16x16xf32>
    %280 = math.exp %279 : vector<16x16xf32>
    %cst_102 = arith.constant dense<0.000000e+00> : vector<16xf32>
    %281 = vector.multi_reduction <add>, %280, %cst_102 [1] : vector<16x16xf32> to vector<16xf32>
    %282 = vector.shape_cast %281 : vector<16xf32> to vector<16x1xf32>
    %283 = tpu.reciprocal %282 {approx = true} : vector<16x1xf32> -> vector<16x1xf32>
    %284 = vector.broadcast %283 : vector<16x1xf32> to vector<16x16xf32>
    %285 = arith.mulf %280, %284 : vector<16x16xf32>
    %286 = arith.truncf %285 : vector<16x16xf32> to vector<16x16xbf16>
    %287 = arith.truncf %268 : vector<16x16xf32> to vector<16x16xbf16>
    %cst_103 = arith.constant dense<0.000000e+00> : vector<16x16xf32>
    %288 = tpu.matmul %286, %287, %cst_103 {dimension_numbers = #tpu.dot_dimension_numbers<[1], [0], [0], [1], [0, 0, 1, 1], [], []>} : vector<16x16xbf16>, vector<16x16xbf16>, vector<16x16xf32> -> vector<16x16xf32>
    %c592 = arith.constant 592 : index
    %c0_104 = arith.constant 0 : index
    %289 = vector.load %arg2[%c592, %c0_104] : memref<768x128xf32, #tpu.memory_space<vmem>>, vector<16x32xf32>
    %290 = arith.truncf %289 : vector<16x32xf32> to vector<16x32xbf16>
    %291 = arith.truncf %288 : vector<16x16xf32> to vector<16x16xbf16>
    %cst_105 = arith.constant dense<0.000000e+00> : vector<16x32xf32>
    %292 = tpu.matmul %291, %290, %cst_105 {dimension_numbers = #tpu.dot_dimension_numbers<[1], [0], [0], [1], [0, 0, 1, 1], [], []>} : vector<16x16xbf16>, vector<16x32xbf16>, vector<16x32xf32> -> vector<16x32xf32>
    %293 = arith.addf %250, %292 : vector<16x32xf32>
    %294 = arith.addf %181, %293 : vector<16x32xf32>
    %c17 = arith.constant 17 : index
    %c0_106 = arith.constant 0 : index
    %295 = vector.load %arg3[%c17, %c0_106] : memref<64x128xf32, #tpu.memory_space<vmem>>, vector<1x32xf32>
    %296 = vector.broadcast %295 : vector<1x32xf32> to vector<16x32xf32>
    %297 = arith.addf %294, %296 : vector<16x32xf32>
    %cst_107 = arith.constant dense<0.000000e+00> : vector<16xf32>
    %298 = vector.multi_reduction <add>, %297, %cst_107 [1] : vector<16x32xf32> to vector<16xf32>
    %299 = vector.shape_cast %298 : vector<16xf32> to vector<16x1xf32>
    %cst_108 = arith.constant 3.200000e+01 : f32
    %300 = vector.broadcast %cst_108 : f32 to vector<16x1xf32>
    %301 = arith.divf %299, %300 : vector<16x1xf32>
    %302 = vector.broadcast %301 : vector<16x1xf32> to vector<16x32xf32>
    %303 = arith.subf %297, %302 : vector<16x32xf32>
    %304 = arith.mulf %303, %303 : vector<16x32xf32>
    %cst_109 = arith.constant dense<0.000000e+00> : vector<16xf32>
    %305 = vector.multi_reduction <add>, %304, %cst_109 [1] : vector<16x32xf32> to vector<16xf32>
    %306 = vector.shape_cast %305 : vector<16xf32> to vector<16x1xf32>
    %cst_110 = arith.constant 3.200000e+01 : f32
    %307 = vector.broadcast %cst_110 : f32 to vector<16x1xf32>
    %308 = arith.divf %306, %307 : vector<16x1xf32>
    %309 = vector.broadcast %301 : vector<16x1xf32> to vector<16x32xf32>
    %310 = arith.subf %297, %309 : vector<16x32xf32>
    %cst_111 = arith.constant 9.99999974E-6 : f32
    %311 = vector.broadcast %cst_111 : f32 to vector<16x1xf32>
    %312 = arith.addf %308, %311 : vector<16x1xf32>
    %313 = math.rsqrt %312 : vector<16x1xf32>
    %314 = vector.broadcast %313 : vector<16x1xf32> to vector<16x32xf32>
    %315 = arith.mulf %310, %314 : vector<16x32xf32>
    %c15 = arith.constant 15 : index
    %c0_112 = arith.constant 0 : index
    %316 = vector.load %arg3[%c15, %c0_112] : memref<64x128xf32, #tpu.memory_space<vmem>>, vector<1x32xf32>
    %317 = vector.broadcast %316 : vector<1x32xf32> to vector<16x32xf32>
    %318 = arith.mulf %315, %317 : vector<16x32xf32>
    %c16 = arith.constant 16 : index
    %c0_113 = arith.constant 0 : index
    %319 = vector.load %arg3[%c16, %c0_113] : memref<64x128xf32, #tpu.memory_space<vmem>>, vector<1x32xf32>
    %320 = vector.broadcast %319 : vector<1x32xf32> to vector<16x32xf32>
    %321 = arith.addf %318, %320 : vector<16x32xf32>
    %322 = arith.truncf %321 : vector<16x32xf32> to vector<16x32xbf16>
    %c608 = arith.constant 608 : index
    %c0_114 = arith.constant 0 : index
    %323 = vector.load %arg2[%c608, %c0_114] : memref<768x128xf32, #tpu.memory_space<vmem>>, vector<32x128xf32>
    %324 = arith.truncf %323 : vector<32x128xf32> to vector<32x128xbf16>
    %cst_115 = arith.constant dense<0.000000e+00> : vector<16x128xf32>
    %325 = tpu.matmul %322, %324, %cst_115 {dimension_numbers = #tpu.dot_dimension_numbers<[1], [0], [0], [1], [0, 0, 1, 1], [], []>} : vector<16x32xbf16>, vector<32x128xbf16>, vector<16x128xf32> -> vector<16x128xf32>
    %c18 = arith.constant 18 : index
    %c0_116 = arith.constant 0 : index
    %326 = vector.load %arg3[%c18, %c0_116] : memref<64x128xf32, #tpu.memory_space<vmem>>, vector<1x128xf32>
    %327 = vector.broadcast %326 : vector<1x128xf32> to vector<16x128xf32>
    %328 = arith.addf %325, %327 : vector<16x128xf32>
    %cst_117 = arith.constant 5.000000e-01 : f32
    %329 = vector.broadcast %cst_117 : f32 to vector<16x128xf32>
    %330 = arith.mulf %329, %328 : vector<16x128xf32>
    %cst_118 = arith.constant 4.471500e-02 : f32
    %331 = vector.broadcast %cst_118 : f32 to vector<16x128xf32>
    %332 = arith.mulf %331, %328 : vector<16x128xf32>
    %333 = arith.mulf %332, %328 : vector<16x128xf32>
    %334 = arith.mulf %333, %328 : vector<16x128xf32>
    %335 = arith.addf %328, %334 : vector<16x128xf32>
    %cst_119 = arith.constant 0.797884583 : f32
    %336 = vector.broadcast %cst_119 : f32 to vector<16x128xf32>
    %337 = arith.mulf %336, %335 : vector<16x128xf32>
    %338 = math.tanh %337 : vector<16x128xf32>
    %cst_120 = arith.constant 1.000000e+00 : f32
    %339 = vector.broadcast %cst_120 : f32 to vector<16x128xf32>
    %340 = arith.addf %339, %338 : vector<16x128xf32>
    %341 = arith.mulf %330, %340 : vector<16x128xf32>
    %342 = arith.truncf %341 : vector<16x128xf32> to vector<16x128xbf16>
    %c640 = arith.constant 640 : index
    %c0_121 = arith.constant 0 : index
    %343 = vector.load %arg2[%c640, %c0_121] : memref<768x128xf32, #tpu.memory_space<vmem>>, vector<128x32xf32>
    %344 = arith.truncf %343 : vector<128x32xf32> to vector<128x32xbf16>
    %cst_122 = arith.constant dense<0.000000e+00> : vector<16x32xf32>
    %345 = tpu.matmul %342, %344, %cst_122 {dimension_numbers = #tpu.dot_dimension_numbers<[1], [0], [0], [1], [0, 0, 1, 1], [], []>} : vector<16x128xbf16>, vector<128x32xbf16>, vector<16x32xf32> -> vector<16x32xf32>
    %346 = arith.addf %297, %345 : vector<16x32xf32>
    %c19 = arith.constant 19 : index
    %c0_123 = arith.constant 0 : index
    %347 = vector.load %arg3[%c19, %c0_123] : memref<64x128xf32, #tpu.memory_space<vmem>>, vector<1x32xf32>
    %348 = vector.broadcast %347 : vector<1x32xf32> to vector<16x32xf32>
    %349 = arith.addf %346, %348 : vector<16x32xf32>
    %cst_124 = arith.constant dense<0.000000e+00> : vector<16xf32>
    %350 = vector.multi_reduction <add>, %349, %cst_124 [1] : vector<16x32xf32> to vector<16xf32>
    %351 = vector.shape_cast %350 : vector<16xf32> to vector<16x1xf32>
    %cst_125 = arith.constant 3.200000e+01 : f32
    %352 = vector.broadcast %cst_125 : f32 to vector<16x1xf32>
    %353 = arith.divf %351, %352 : vector<16x1xf32>
    %354 = vector.broadcast %353 : vector<16x1xf32> to vector<16x32xf32>
    %355 = arith.subf %349, %354 : vector<16x32xf32>
    %356 = arith.mulf %355, %355 : vector<16x32xf32>
    %cst_126 = arith.constant dense<0.000000e+00> : vector<16xf32>
    %357 = vector.multi_reduction <add>, %356, %cst_126 [1] : vector<16x32xf32> to vector<16xf32>
    %358 = vector.shape_cast %357 : vector<16xf32> to vector<16x1xf32>
    %cst_127 = arith.constant 3.200000e+01 : f32
    %359 = vector.broadcast %cst_127 : f32 to vector<16x1xf32>
    %360 = arith.divf %358, %359 : vector<16x1xf32>
    %361 = vector.broadcast %353 : vector<16x1xf32> to vector<16x32xf32>
    %362 = arith.subf %349, %361 : vector<16x32xf32>
    %cst_128 = arith.constant 9.99999974E-6 : f32
    %363 = vector.broadcast %cst_128 : f32 to vector<16x1xf32>
    %364 = arith.addf %360, %363 : vector<16x1xf32>
    %365 = math.rsqrt %364 : vector<16x1xf32>
    %366 = vector.broadcast %365 : vector<16x1xf32> to vector<16x32xf32>
    %367 = arith.mulf %362, %366 : vector<16x32xf32>
    %c26 = arith.constant 26 : index
    %c0_129 = arith.constant 0 : index
    %368 = vector.load %arg3[%c26, %c0_129] : memref<64x128xf32, #tpu.memory_space<vmem>>, vector<1x32xf32>
    %369 = vector.broadcast %368 : vector<1x32xf32> to vector<16x32xf32>
    %370 = arith.mulf %367, %369 : vector<16x32xf32>
    %c27 = arith.constant 27 : index
    %c0_130 = arith.constant 0 : index
    %371 = vector.load %arg3[%c27, %c0_130] : memref<64x128xf32, #tpu.memory_space<vmem>>, vector<1x32xf32>
    %372 = vector.broadcast %371 : vector<1x32xf32> to vector<16x32xf32>
    %373 = arith.addf %370, %372 : vector<16x32xf32>
    %374 = arith.truncf %373 : vector<16x32xf32> to vector<16x32xbf16>
    %c32_131 = arith.constant 32 : index
    %c0_132 = arith.constant 0 : index
    %375 = vector.load %arg3[%c32_131, %c0_132] : memref<64x128xf32, #tpu.memory_space<vmem>>, vector<32x128xf32>
    %376 = arith.truncf %375 : vector<32x128xf32> to vector<32x128xbf16>
    %cst_133 = arith.constant dense<0.000000e+00> : vector<16x128xf32>
    %377 = tpu.matmul %374, %376, %cst_133 {dimension_numbers = #tpu.dot_dimension_numbers<[1], [0], [0], [1], [0, 0, 1, 1], [], []>} : vector<16x32xbf16>, vector<32x128xbf16>, vector<16x128xf32> -> vector<16x128xf32>
    %c0_134 = arith.constant 0 : index
    %c0_135 = arith.constant 0 : index
    %378 = vector.load %arg4[%c0_134, %c0_135] : memref<16x128xf32, #tpu.memory_space<vmem>>, vector<16x128xf32>
    tpu.vector_store %arg4[%c0_134, %c0_135], %377 {strides = array<i32>} : memref<16x128xf32, #tpu.memory_space<vmem>>, vector<16x128xf32>,
    return
  }
  func.func @transform_0(%arg0: i32) -> (i32, i32) {
    %c0_i32 = arith.constant 0 : i32
    %c0_i32_0 = arith.constant 0 : i32
    %c0_i32_1 = arith.constant 0 : i32
    return %c0_i32, %c0_i32_0 : i32, i32
  }
  func.func @transform_1(%arg0: i32) -> (i32, i32) {
    %c0_i32 = arith.constant 0 : i32
    %c0_i32_0 = arith.constant 0 : i32
    %c0_i32_1 = arith.constant 0 : i32
    return %c0_i32, %c0_i32_0 : i32, i32
  }
  func.func @transform_2(%arg0: i32) -> (i32, i32) {
    %c0_i32 = arith.constant 0 : i32
    %c0_i32_0 = arith.constant 0 : i32
    %c0_i32_1 = arith.constant 0 : i32
    return %c0_i32, %c0_i32_0 : i32, i32
  }
  func.func @transform_3(%arg0: i32) -> (i32, i32) {
    %c0_i32 = arith.constant 0 : i32
    %c0_i32_0 = arith.constant 0 : i32
    %c0_i32_1 = arith.constant 0 : i32
    return %c0_i32, %c0_i32_0 : i32, i32
  }
}

</mosaic_0001>

<bundles_post_ra>
// kernel: _forward_fn.1
= control target key start
LH: loop header
LB: loop body
LE: loop exit
PB: predicated region body
PF: predicated region fallthrough
CT: control target
= control target key end

     0   :  { %8 = vsyncpa [#allocation3], 0  ;;  %s2394_s12 = smov [#allocation2]   ;;  %s2811_s0 = inlined_call_operand.vmem [shape: f32[16,32], index: 0, kind: input, shape index: {}]   ;;  %s2812_s1 = inlined_call_operand.hbm [shape: f32[768,128], index: 1, kind: input, shape index: {}]   ;;  %s2813_s2 = inlined_call_operand.vmem [shape: f32[64,128], index: 2, kind: input, shape index: {}]   ;;  %s2814_s3 = inlined_call_operand.vmem [shape: f32[16,128], index: 3, kind: output, shape index: {}]  }
   0x1   :  { %s16_s13 = sshll.u32 %s2394_s12, 4  ;;  %s17_s13 = int_to_ptr.vmem [resolvable:$true] %s16_s13 }
   0x2   :  { %s2380_s14 = scalar_lea.vmem %s17_s13, 12288  ;;  %p2385_p1 = scmp.lt.s32.totalorder %s17_s13, %s17_s13 }
   0x3   :  { %p2381_p0 = scmp.ne.s32.totalorder %s17_s13, %s2380_s14  ;;  %p2386_p2 = scmp.lt.s32.totalorder %s2380_s14, %s2380_s14 }
   0x5   :  { %p2387_p3 = por %p2386_p2, %p2385_p1 }
   0x7   :  { %p2388_p4 = pnand %p2387_p3, %p2381_p0 }
   0x9   :  { %2391 = shalt.err (!%p2388_p4)
}
   0xa   :  { %s2395_s15 = smov 128   ;;  %s2396_s16 = smov 8  }
   0xb   :  { %22 = dma.hbm_to_vmem [thread:$0]  %s2812_s1, 12288, %s17_s13, [#allocation3], %s2395_s15, %s2395_s15, %s2396_s16  }
   0xc   :  { %2392 = dma.done.wait [#allocation3], 12288  }
   0xd   :  { %2393 = vsyncadd [#allocation3], 4294955008  ;;  %vm48_vm0 = vcmask 261120   ;;  %v2425_v0 = vld [vmem:[%s2811_s0] sm:$0xff]  ;;  %v2430_v1 = vld [vmem:[%s2811_s0 + $0x8] sm:$0xff]  ;;  %v2397_v19 = vmov 0.0  }
   0xe   :  { %v49_v2 = vsel %vm48_vm0, %v2425_v0, 0.0  ;;  %v52_v3 = vsel %vm48_vm0, %v2430_v1, 0.0  ;;  %v93_v14 = vld [vmem:[#allocation2 + $0x10] sm:$0xff]  ;;  %v94_v15 = vld [vmem:[#allocation2 + $0x18] sm:$0xff]  ;;  %2075 = vmatprep.subr.bf16.mxu1 %v2397_v19  ;;  %2091 = vmatprep.subr.bf16.mxu0 %v2397_v19  ;;  %v91_v21 = vld [vmem:[#allocation2] sm:$0xff]  ;;  %vm2398_vm1 = vmmov 0  }
   0xf   :  { %50 = vadd.xlane.f32.xlu0 %v49_v2  ;;  %v200_v16 = vld [vmem:[#allocation2 + $0x50] sm:$0xff]  ;;  %v96_v17 = vpack.c.bf16 %v94_v15, %v93_v14  ;;  %v201_v18 = vld [vmem:[#allocation2 + $0x58] sm:$0xff]  ;;  %v92_v22 = vld [vmem:[#allocation2 + $0x8] sm:$0xff]  ;;  %2079 = vmatprep.mubr.msk.bf16.mxu1 %vm2398_vm1, %v2397_v19  ;;  %vm252_vm2 = vcmask 130048  }
  0x10   :  { %v203_v20 = vpack.c.bf16 %v201_v18, %v200_v16  ;;  %v198_v23 = vld [vmem:[#allocation2 + $0x40] sm:$0xff]  ;;  %v95_v24 = vpack.c.bf16 %v92_v22, %v91_v21  ;;  %v199_v25 = vld [vmem:[#allocation2 + $0x48] sm:$0xff]  ;;  %2095 = vmatprep.mubr.msk.bf16.mxu0 %vm2398_vm1, %v2397_v19  ;;  %v148_v41 = vld [vmem:[#allocation2 + $0x30] sm:$0xff] }
  0x11   :  { %2076 = vmatpush3.bf16.msra.mxu1 %v96_v17  ;;  %v202_v26 = vpack.c.bf16 %v199_v25, %v198_v23  ;;  %v1933_v35 = vld [vmem:[%s2813_s2] ss:$0 sm:$0xff]  ;;  %v1934_v39 = vld [vmem:[%s2813_s2 + $0x1] ss:$0 sm:$0xff]  ;;  %v149_v42 = vld [vmem:[#allocation2 + $0x38] sm:$0xff] }
  0x12   :  { %2092 = vmatpush3.bf16.msra.mxu0 %v203_v20  ;;  %2077 = vmatprep.subr.bf16.mxu1 %v2397_v19  ;;  %v151_v45 = vpack.c.bf16 %v149_v42, %v148_v41  ;;  %v146_v47 = vld [vmem:[#allocation2 + $0x20] sm:$0xff]  ;;  %v147_v48 = vld [vmem:[#allocation2 + $0x28] sm:$0xff]  ;;  %v482_v20 = vld [vmem:[#allocation2 + $0xb0] sm:$0xff] }
  0x13   :  { %53 = vadd.xlane.f32.xlu0 %v52_v3  ;;  %2093 = vmatprep.subr.bf16.mxu0 %v2397_v19  ;;  %v150_v49 = vpack.c.bf16 %v147_v48, %v146_v47  ;;  %v1939_v52 = vld [vmem:[%s2813_s2 + $0x9] ss:$0 sm:$0xff]  ;;  %v1937_v63 = vld [vmem:[%s2813_s2 + $0x8] ss:$0 sm:$0xff]  ;;  %v376_v16 = vld [vmem:[#allocation2 + $0x60] sm:$0xff] }
  0x14   :  { %v377_v17 = vld [vmem:[#allocation2 + $0x68] sm:$0xff]  ;;  %v483_v21 = vld [vmem:[#allocation2 + $0xb8] sm:$0xff]  ;;  %v480_v23 = vld [vmem:[#allocation2 + $0xa0] sm:$0xff] }
  0x15   :  { %2078 = vmatpush3.bf16.msra.mxu1 %v95_v24  ;;  %v380_v18 = vpack.c.bf16 %v377_v17, %v376_v16  ;;  %v485_v22 = vpack.c.bf16 %v483_v21, %v482_v20  ;;  %v481_v24 = vld [vmem:[#allocation2 + $0xa8] sm:$0xff]  ;;  %v430_v16 = vld [vmem:[#allocation2 + $0x90] sm:$0xff]  ;;  %v431_v17 = vld [vmem:[#allocation2 + $0x98] sm:$0xff] }
  0x16   :  { %2094 = vmatpush3.bf16.msra.mxu0 %v202_v26  ;;  %2083 = vmatprep.subr.bf16.mxu1 %v2397_v19  ;;  %v484_v25 = vpack.c.bf16 %v481_v24, %v480_v23  ;;  %v31_v26 = vlaneseq  ;;  %v428_v24 = vld [vmem:[#allocation2 + $0x80] sm:$0xff] }
  0x17   :  { %2105 = vmatprep.subr.bf16.mxu0 %v2397_v19 }
  0x98   :  { %v51_v4 = vpop.xlane.xlu0 %50 }
  0x99   :  { %v56_v5 = vmul.f32 0.03125, %v51_v4 }
  0x9b   :  { %v58_v6 = vsub.f32 %v2425_v0, %v56_v5 }
  0x9c   :  { %v54_v7 = vpop.xlane.xlu0 %53 }
  0x9d   :  { %v57_v8 = vmul.f32 0.03125, %v54_v7  ;;  %v60_v9 = vmul.f32 %v58_v6, %v58_v6 }
  0x9f   :  { %v59_v10 = vsub.f32 %v2430_v1, %v57_v8  ;;  %v62_v11 = vsel %vm48_vm0, %v60_v9, 0.0  ;;  %v1935_v9 = vld [vmem:[%s2813_s2 + $0x7] ss:$0 sm:$0xff] }
  0xa0   :  { %63 = vadd.xlane.f32.xlu1 %v62_v11  ;;  %v378_v11 = vld [vmem:[#allocation2 + $0x70] sm:$0xff] }
  0xa1   :  { %v61_v12 = vmul.f32 %v59_v10, %v59_v10 }
  0xa3   :  { %v65_v13 = vsel %vm48_vm0, %v61_v12, 0.0  ;;  %v379_v12 = vld [vmem:[#allocation2 + $0x78] sm:$0xff] }
  0xa4   :  { %66 = vadd.xlane.f32.xlu1 %v65_v13  ;;  %v381_v14 = vpack.c.bf16 %v379_v12, %v378_v11 }
 0x129   :  { %v64_v27 = vpop.xlane.xlu1 %63 }
 0x12a   :  { %v68_v28 = vmul.f32 0.03125, %v64_v27  ;;  %v32_v27 = vshrl.u32 %v31_v26, 7 }
 0x12c   :  { %v70_v29 = vadd.f32 1e-05, %v68_v28  ;;  %v35_v28 = vand.u32 127, %v31_v26 }
 0x12d   :  { %v67_v30 = vpop.xlane.xlu1 %66 }
 0x12e   :  { %2312 = vrsqrt.f32 %v70_v29  ;;  %v69_v31 = vmul.f32 0.03125, %v67_v30  ;;  %v36_v29 = vshra.s32 %v32_v27, 3  ;;  %v38_v30 = vshra.s32 %v35_v28, 3 }
 0x130   :  { %v71_v32 = vadd.f32 1e-05, %v69_v31  ;;  %v41_v31 = vand.u32 7, %v35_v28  ;;  %vm39_vm3 = vcmp.eq.s32.totalorder %v36_v29, %v38_v30 }
 0x132   :  { %2314 = vrsqrt.f32 %v71_v32  ;;  %v42_v32 = vand.u32 7, %v32_v27 }
 0x134   :  { %vm44_vm4 = vcmp.le.s32.totalorder %v41_v31, %v42_v32 }
 0x135   :  { %vm2499_vm5 = vmand %vm39_vm3, %vm44_vm4 }
 0x13b   :  { %v2313_v33 = vpop.eup %2312 }
 0x13c   :  { %v74_v34 = vmul.f32 %v2313_v33, %v58_v6  ;;  %v33_v33 = vadd.s32 8, %v32_v27 }
 0x13e   :  { %v81_v37 = vmul.f32 %v1933_v35, %v74_v34  ;;  %v37_v34 = vshra.s32 %v33_v33, 3 }
 0x13f   :  { %v2315_v36 = vpop.eup %2314 }
 0x140   :  { %v75_v38 = vmul.f32 %v2315_v36, %v59_v10  ;;  %v88_v43 = vadd.f32 %v1934_v39, %v81_v37  ;;  %vm40_vm6 = vcmp.eq.s32.totalorder %v37_v34, %v38_v30 }
 0x142   :  { %v82_v40 = vmul.f32 %v1933_v35, %v75_v38  ;;  %v43_v35 = vand.u32 7, %v33_v33  ;;  %v1945_v33 = vld [vmem:[%s2813_s2 + $0xb] ss:$0 sm:$0xff] }
 0x144   :  { %v89_v44 = vadd.f32 %v1934_v39, %v82_v40  ;;  %vm45_vm7 = vcmp.le.s32.totalorder %v41_v31, %v43_v35 }
 0x145   :  { %vm2506_vm8 = vmand %vm40_vm6, %vm45_vm7 }
 0x146   :  { %v2456_v46 = vpack.c.bf16 %v89_v44, %v88_v43 }
 0x148   :  { %2080 = vmatmul.mubr.msk.bf16.vlgmr.msra.gmra.mxu1 %vm48_vm0, %v2456_v46  ;;  %2096 = vmatmul.mubr.msk.bf16.vlgmr.msra.gmra.mxu0 %vm48_vm0, %v2456_v46 }
 0x149   :  { %2084 = vmatpush3.bf16.msra.mxu1 %v151_v45  ;;  %2087 = vmatprep.mubr.msk.bf16.mxu1 %vm2398_vm1, %v2397_v19 }
 0x14a   :  { %2085 = vmatprep.subr.bf16.mxu1 %v2397_v19  ;;  %2107 = vmatprep.mubr.msk.bf16.mxu0 %vm2398_vm1, %v2397_v19 }
 0x14d   :  { %2086 = vmatpush3.bf16.msra.mxu1 %v150_v49 }
 0x14e   :  { %2099 = vmatprep.subr.bf16.mxu1 %v2397_v19 }
 0x150   :  { %2088 = vmatmul.mubr.msk.bf16.vlgmr.msra.gmra.mxu1 %vm48_vm0, %v2456_v46 }
 0x151   :  { %2101 = vmatprep.mubr.msk.bf16.mxu1 %vm2398_vm1, %v2397_v19 }
 0x208   :  { %v139_v50 = vpop.f32.mrf.mxu1  ;;  %v243_v51 = vpop.f32.mrf.mxu0 }
 0x209   :  { %v244_v57 = vadd.f32 %v1939_v52, %v243_v51  ;;  %v140_v13 = vadd.f32 %v1935_v9, %v139_v50  ;;  %v1943_v50 = vld [vmem:[%s2813_s2 + $0xa] ss:$0 sm:$0xff] }
 0x20a   :  { %v2081_v53 = vpop.f32.mrf.mxu1  ;;  %v2097_v54 = vpop.f32.mrf.mxu0 }
 0x20c   :  { %v142_v55 = vpop.f32.mrf.mxu1  ;;  %v246_v56 = vpop.f32.mrf.mxu0 }
 0x20d   :  { %v247_v58 = vadd.f32 %v1939_v52, %v246_v56  ;;  %v143_v10 = vadd.f32 %v1935_v9, %v142_v55 }
 0x20e   :  { %v2082_v59 = vpop.f32.mrf.mxu1  ;;  %v2098_v60 = vpop.f32.mrf.mxu0 }
 0x20f   :  { %v327_v61 = vpack.c.bf16 %v247_v58, %v244_v57  ;;  %v250_v15 = vpack.c.bf16 %v143_v10, %v140_v13  ;;  %v1947_v58 = vld [vmem:[%s2813_s2 + $0xc] ss:$0 sm:$0xff] }
 0x210   :  { %v191_v62 = vpop.f32.mrf.mxu1 }
 0x211   :  { %2106 = vmatpush3.bf16.msra.mxu0 %v327_v61  ;;  %v192_v4 = vadd.f32 %v1937_v63, %v191_v62 }
 0x212   :  { %v2089_v2 = vpop.f32.mrf.mxu1  ;;  %2119 = vmatprep.subr.bf16.mxu0 %v2397_v19 }
 0x214   :  { %v194_v3 = vpop.f32.mrf.mxu1 }
 0x215   :  { %v195_v5 = vadd.f32 %v1937_v63, %v194_v3 }
 0x216   :  { %v2090_v6 = vpop.f32.mrf.mxu1 }
 0x217   :  { %v251_v7 = vpack.c.bf16 %v195_v5, %v192_v4 }
 0x219   :  { %v257_v8 = vsel %vm252_vm2, %v251_v7, 0 }
 0x21a   :  { %2100 = vmatpush3.bf16.xpose.msra.mxu1 %v257_v8 }
 0x21b   :  { %2111 = vmatprep.subr.bf16.mxu1 %v2397_v19 }
 0x221   :  { %2102 = vmatmul.mubr.msk.bf16.vlgmr.msra.gmra.mxu1 %vm252_vm2, %v250_v15 }
 0x222   :  { %2112 = vmatpush3.bf16.msra.mxu1 %v381_v14  ;;  %2115 = vmatprep.mubr.msk.bf16.mxu1 %vm2398_vm1, %v2397_v19 }
 0x223   :  { %2113 = vmatprep.subr.bf16.mxu1 %v2397_v19 }
 0x226   :  { %2114 = vmatpush3.bf16.msra.mxu1 %v380_v18 }
 0x227   :  { %2127 = vmatprep.subr.bf16.mxu1 %v2397_v19 }
 0x229   :  { %2116 = vmatmul.mubr.msk.bf16.vlgmr.msra.gmra.mxu1 %vm48_vm0, %v2456_v46 }
 0x22a   :  { %2128 = vmatpush3.bf16.msra.mxu1 %v485_v22  ;;  %2131 = vmatprep.mubr.msk.bf16.mxu1 %vm2398_vm1, %v2397_v19  ;;  %v433_v22 = vpack.c.bf16 %v431_v17, %v430_v16 }
 0x22b   :  { %2129 = vmatprep.subr.bf16.mxu1 %v2397_v19 }
 0x22e   :  { %2130 = vmatpush3.bf16.msra.mxu1 %v484_v25  ;;  %v429_v25 = vld [vmem:[#allocation2 + $0x88] sm:$0xff] }
 0x22f   :  { %2141 = vmatprep.subr.bf16.mxu1 %v2397_v19  ;;  %v432_v26 = vpack.c.bf16 %v429_v25, %v428_v24 }
 0x231   :  { %2132 = vmatmul.mubr.msk.bf16.vlgmr.msra.gmra.mxu1 %vm48_vm0, %v2456_v46 }
 0x232   :  { %2143 = vmatprep.mubr.msk.bf16.mxu1 %vm2398_vm1, %v2397_v19 }
 0x2e1   :  { %v293_v36 = vpop.f32.mrf.mxu1 }
 0x2e2   :  { %v300_v38 = vmul.f32 0.25, %v293_v36 }
 0x2e3   :  { %v2103_v39 = vpop.f32.mrf.mxu1 }
 0x2e4   :  { %v302_v40 = vsel %vm2499_vm5, %v300_v38, -1e+30 }
 0x2e5   :  { %v296_v41 = vpop.f32.mrf.mxu1  ;;  %v304_v42 = vsel %vm252_vm2, %v302_v40, -inf }
 0x2e6   :  { %v301_v44 = vmul.f32 0.25, %v296_v41  ;;  %305 = vmax.xlane.f32.xlu0 %v304_v42 }
 0x2e7   :  { %v2104_v45 = vpop.f32.mrf.mxu1 }
 0x2e8   :  { %v303_v47 = vsel %vm2506_vm8, %v301_v44, -1e+30 }
 0x2e9   :  { %v421_v48 = vpop.f32.mrf.mxu1  ;;  %v307_v49 = vsel %vm252_vm2, %v303_v47, -inf }
 0x2ea   :  { %308 = vmax.xlane.f32.xlu1 %v307_v49  ;;  %v2516_v53 = vadd.f32 %v1943_v50, %v421_v48 }
 0x2eb   :  { %v2117_v51 = vpop.f32.mrf.mxu1 }
 0x2ed   :  { %v424_v52 = vpop.f32.mrf.mxu1 }
 0x2ee   :  { %v2518_v54 = vadd.f32 %v1943_v50, %v424_v52 }
 0x2ef   :  { %v2118_v55 = vpop.f32.mrf.mxu1 }
 0x2f0   :  { %v532_v56 = vpack.c.bf16 %v2518_v54, %v2516_v53 }
 0x2f1   :  { %v525_v57 = vpop.f32.mrf.mxu1 }
 0x2f2   :  { %v526_v61 = vadd.f32 %v1947_v58, %v525_v57 }
 0x2f3   :  { %v2133_v59 = vpop.f32.mrf.mxu1 }
 0x2f5   :  { %v528_v60 = vpop.f32.mrf.mxu1 }
 0x2f6   :  { %v529_v62 = vadd.f32 %v1947_v58, %v528_v60 }
 0x2f7   :  { %v2134_v63 = vpop.f32.mrf.mxu1 }
 0x2f8   :  { %v608_v2 = vpack.c.bf16 %v529_v62, %v526_v61 }
 0x2fa   :  { %2142 = vmatpush3.bf16.msra.mxu1 %v608_v2 }
 0x2fb   :  { %2153 = vmatprep.subr.bf16.mxu1 %v2397_v19 }
 0x36f   :  { %v306_v3 = vpop.xlane.xlu0 %305 }
 0x370   :  { %v310_v4 = vsub.f32 %v302_v40, %v306_v3 }
 0x372   :  { %v312_v5 = vmul.f32 1.442695, %v310_v4  ;;  %v372_v4 = vld [vmem:[#allocation2 + $0xc0] sm:$0xff] }
 0x373   :  { %v309_v6 = vpop.xlane.xlu1 %308 }
 0x374   :  { %2316 = vpow2.f32 %v312_v5  ;;  %v311_v7 = vsub.f32 %v303_v47, %v309_v6  ;;  %v373_v5 = vld [vmem:[#allocation2 + $0xc8] sm:$0xff] }
 0x376   :  { %v314_v8 = vmul.f32 1.442695, %v311_v7 }
 0x378   :  { %2318 = vpow2.f32 %v314_v8 }
 0x381   :  { %v2317_v9 = vpop.eup %2316 }
 0x382   :  { %v316_v10 = vsel %vm252_vm2, %v2317_v9, 0.0 }
 0x383   :  { %317 = vadd.xlane.f32.xlu0 %v316_v10 }
 0x385   :  { %v2319_v11 = vpop.eup %2318 }
 0x386   :  { %v319_v12 = vsel %vm252_vm2, %v2319_v11, 0.0 }
 0x387   :  { %320 = vadd.xlane.f32.xlu1 %v319_v12  ;;  %v654_v12 = vld [vmem:[#allocation2 + $0xd8] sm:$0xff] }
 0x40c   :  { %v318_v13 = vpop.xlane.xlu0 %317 }
 0x40d   :  { %2320 = vrcp.f32 %v318_v13 }
 0x410   :  { %v321_v14 = vpop.xlane.xlu1 %320 }
 0x411   :  { %2322 = vrcp.f32 %v321_v14 }
 0x41a   :  { %v2321_v15 = vpop.eup %2320 }
 0x41b   :  { %v324_v20 = vmul.f32 %v2321_v15, %v2317_v9  ;;  %v374_v9 = vpack.c.bf16 %v373_v5, %v372_v4 }
 0x41e   :  { %v2323_v18 = vpop.eup %2322 }
 0x41f   :  { %v325_v21 = vmul.f32 %v2323_v18, %v2319_v11  ;;  %v653_v11 = vld [vmem:[#allocation2 + $0xd0] sm:$0xff] }
 0x420   :  { %v655_v13 = vpack.c.bf16 %v654_v12, %v653_v11  ;;  %v881_v11 = vld [vmem:[#allocation2 + $0x160] sm:$0xff]  ;;  %v882_v12 = vld [vmem:[#allocation2 + $0x168] sm:$0xff] }
 0x421   :  { %v326_v23 = vpack.c.bf16 %v325_v21, %v324_v20 }
 0x423   :  { %2108 = vmatmul.mubr.msk.bf16.vlgmr.msra.gmra.mxu0 %vm252_vm2, %v326_v23 }
 0x424   :  { %2120 = vmatpush3.bf16.msra.mxu0 %v433_v22  ;;  %2123 = vmatprep.mubr.msk.bf16.mxu0 %vm2398_vm1, %v2397_v19 }
 0x425   :  { %2121 = vmatprep.subr.bf16.mxu0 %v2397_v19 }
 0x428   :  { %2122 = vmatpush3.bf16.msra.mxu0 %v432_v26  ;;  %v1953_v26 = vld [vmem:[%s2813_s2 + $0x4] ss:$0 sm:$0xff] }
 0x429   :  { %2135 = vmatprep.subr.bf16.mxu0 %v2397_v19 }
 0x42b   :  { %2124 = vmatmul.mubr.msk.bf16.vlgmr.msra.gmra.mxu0 %vm48_vm0, %v2456_v46 }
 0x42c   :  { %2137 = vmatprep.mubr.msk.bf16.mxu0 %vm2398_vm1, %v2397_v19 }
 0x4e3   :  { %v365_v27 = vpop.f32.mrf.mxu0 }
 0x4e5   :  { %v2109_v28 = vpop.f32.mrf.mxu0 }
 0x4e7   :  { %v368_v29 = vpop.f32.mrf.mxu0 }
 0x4e8   :  { %v375_v30 = vpack.c.bf16 %v368_v29, %v365_v27 }
 0x4e9   :  { %v2110_v31 = vpop.f32.mrf.mxu0 }
 0x4eb   :  { %v473_v32 = vpop.f32.mrf.mxu0 }
 0x4ec   :  { %v474_v36 = vadd.f32 %v1945_v33, %v473_v32 }
 0x4ed   :  { %v2125_v34 = vpop.f32.mrf.mxu0 }
 0x4ef   :  { %v476_v35 = vpop.f32.mrf.mxu0 }
 0x4f0   :  { %v477_v38 = vadd.f32 %v1945_v33, %v476_v35 }
 0x4f1   :  { %v2126_v39 = vpop.f32.mrf.mxu0 }
 0x4f2   :  { %v533_v40 = vpack.c.bf16 %v477_v38, %v474_v36 }
 0x4f4   :  { %v538_v46 = vsel %vm252_vm2, %v533_v40, 0 }
 0x4f5   :  { %2136 = vmatpush3.bf16.xpose.msra.mxu0 %v538_v46 }
 0x4f6   :  { %2147 = vmatprep.subr.bf16.mxu0 %v2397_v19 }
 0x4fc   :  { %2138 = vmatmul.mubr.msk.bf16.vlgmr.msra.gmra.mxu0 %vm252_vm2, %v532_v56 }
 0x4fd   :  { %2149 = vmatprep.mubr.msk.bf16.mxu0 %vm2398_vm1, %v2397_v19  ;;  %2148 = vmatpush3.bf16.msra.mxu0 %v655_v13  ;;  %v891_v13 = vpack.c.bf16 %v882_v12, %v881_v11 }
 0x4fe   :  { %2159 = vmatprep.subr.bf16.mxu0 %v2397_v19 }
 0x5bc   :  { %v574_v41 = vpop.f32.mrf.mxu0 }
 0x5bd   :  { %v581_v42 = vmul.f32 0.25, %v574_v41 }
 0x5be   :  { %v2139_v44 = vpop.f32.mrf.mxu0 }
 0x5bf   :  { %v583_v45 = vsel %vm2499_vm5, %v581_v42, -1e+30 }
 0x5c0   :  { %v577_v47 = vpop.f32.mrf.mxu0  ;;  %v585_v48 = vsel %vm252_vm2, %v583_v45, -inf }
 0x5c1   :  { %v582_v49 = vmul.f32 0.25, %v577_v47  ;;  %586 = vmax.xlane.f32.xlu0 %v585_v48  ;;  %v797_v47 = vld [vmem:[#allocation2 + $0xf0] sm:$0xff]  ;;  %v798_v48 = vld [vmem:[#allocation2 + $0xf8] sm:$0xff] }
 0x5c2   :  { %v2140_v50 = vpop.f32.mrf.mxu0 }
 0x5c3   :  { %v584_v51 = vsel %vm2506_vm8, %v582_v49, -1e+30  ;;  %v800_v49 = vpack.c.bf16 %v798_v48, %v797_v47  ;;  %v795_v50 = vld [vmem:[#allocation2 + $0xe0] sm:$0xff] }
 0x5c4   :  { %v588_v52 = vsel %vm252_vm2, %v584_v51, -inf }
 0x5c5   :  { %589 = vmax.xlane.f32.xlu1 %v588_v52 }
 0x64a   :  { %v587_v53 = vpop.xlane.xlu0 %586 }
 0x64b   :  { %v591_v54 = vsub.f32 %v583_v45, %v587_v53 }
 0x64d   :  { %v593_v55 = vmul.f32 1.442695, %v591_v54 }
 0x64e   :  { %v590_v56 = vpop.xlane.xlu1 %589 }
 0x64f   :  { %2324 = vpow2.f32 %v593_v55  ;;  %v592_v57 = vsub.f32 %v584_v51, %v590_v56  ;;  %v796_v51 = vld [vmem:[#allocation2 + $0xe8] sm:$0xff] }
 0x650   :  { %v799_v52 = vpack.c.bf16 %v796_v51, %v795_v50 }
 0x651   :  { %v595_v58 = vmul.f32 1.442695, %v592_v57 }
 0x653   :  { %2326 = vpow2.f32 %v595_v58 }
 0x65c   :  { %v2325_v59 = vpop.eup %2324 }
 0x65d   :  { %v597_v60 = vsel %vm252_vm2, %v2325_v59, 0.0 }
 0x65e   :  { %598 = vadd.xlane.f32.xlu0 %v597_v60 }
 0x660   :  { %v2327_v61 = vpop.eup %2326 }
 0x661   :  { %v600_v62 = vsel %vm252_vm2, %v2327_v61, 0.0 }
 0x662   :  { %601 = vadd.xlane.f32.xlu1 %v600_v62 }
 0x6e7   :  { %v599_v63 = vpop.xlane.xlu0 %598 }
 0x6e8   :  { %2328 = vrcp.f32 %v599_v63 }
 0x6eb   :  { %v602_v2 = vpop.xlane.xlu1 %601 }
 0x6ec   :  { %2330 = vrcp.f32 %v602_v2 }
 0x6f5   :  { %v2329_v3 = vpop.eup %2328 }
 0x6f6   :  { %v605_v7 = vmul.f32 %v2329_v3, %v2325_v59  ;;  %v1955_v3 = vld [vmem:[%s2813_s2 + $0x3] ss:$0 sm:$0xff] }
 0x6f9   :  { %v2331_v6 = vpop.eup %2330 }
 0x6fa   :  { %v606_v8 = vmul.f32 %v2331_v6, %v2327_v61  ;;  %v1954_v61 = vld [vmem:[%s2813_s2 + $0x2] ss:$0 sm:$0xff] }
 0x6fc   :  { %v607_v10 = vpack.c.bf16 %v606_v8, %v605_v7  ;;  %v883_v8 = vld [vmem:[#allocation2 + $0x170] sm:$0xff] }
 0x6fe   :  { %2144 = vmatmul.mubr.msk.bf16.vlgmr.msra.gmra.mxu1 %vm252_vm2, %v607_v10 }
 0x6ff   :  { %2154 = vmatpush3.bf16.msra.mxu1 %v374_v9  ;;  %2155 = vmatprep.mubr.msk.bf16.mxu1 %vm2398_vm1, %v2397_v19  ;;  %v884_v9 = vld [vmem:[#allocation2 + $0x178] sm:$0xff] }
 0x700   :  { %2167 = vmatprep.subr.bf16.mxu1 %v2397_v19  ;;  %v892_v10 = vpack.c.bf16 %v884_v9, %v883_v8 }
 0x706   :  { %2156 = vmatmul.mubr.msk.bf16.vlgmr.msra.gmra.mxu1 %vm252_vm2, %v375_v30 }
 0x707   :  { %2183 = vmatprep.mubr.msk.bf16.mxu1 %vm2398_vm1, %v2397_v19  ;;  %2168 = vmatpush3.bf16.msra.mxu1 %v892_v10 }
 0x708   :  { %2169 = vmatprep.subr.bf16.mxu1 %v2397_v19 }
 0x70b   :  { %2170 = vmatpush3.bf16.msra.mxu1 %v891_v13 }
 0x70c   :  { %2171 = vmatprep.subr.bf16.mxu1 %v2397_v19 }
 0x7be   :  { %v646_v14 = vpop.f32.mrf.mxu1 }
 0x7c0   :  { %v2145_v15 = vpop.f32.mrf.mxu1 }
 0x7c1   :  { %v880_v15 = vld [vmem:[#allocation2 + $0x158] sm:$0xff] }
 0x7c2   :  { %v649_v16 = vpop.f32.mrf.mxu1 }
 0x7c3   :  { %v656_v17 = vpack.c.bf16 %v649_v16, %v646_v14  ;;  %v879_v14 = vld [vmem:[#allocation2 + $0x150] sm:$0xff] }
 0x7c4   :  { %v2146_v18 = vpop.f32.mrf.mxu1  ;;  %v890_v16 = vpack.c.bf16 %v880_v15, %v879_v14 }
 0x7c5   :  { %2150 = vmatmul.mubr.msk.bf16.vlgmr.msra.gmra.mxu0 %vm252_vm2, %v656_v17  ;;  %v877_v17 = vld [vmem:[#allocation2 + $0x140] sm:$0xff]  ;;  %v878_v18 = vld [vmem:[#allocation2 + $0x148] sm:$0xff] }
 0x7c6   :  { %v738_v20 = vpop.f32.mrf.mxu1  ;;  %2163 = vmatprep.mubr.msk.bf16.mxu0 %vm2398_vm1, %v2397_v19  ;;  %2160 = vmatpush3.bf16.msra.mxu0 %v800_v49 }
 0x7c7   :  { %2161 = vmatprep.subr.bf16.mxu0 %v2397_v19  ;;  %2172 = vmatpush3.bf16.msra.mxu1 %v890_v16 }
 0x7c8   :  { %v2157_v21 = vpop.f32.mrf.mxu1  ;;  %2173 = vmatprep.subr.bf16.mxu1 %v2397_v19 }
 0x7c9   :  { %v875_v21 = vld [vmem:[#allocation2 + $0x130] sm:$0xff] }
 0x7ca   :  { %v741_v22 = vpop.f32.mrf.mxu1  ;;  %2162 = vmatpush3.bf16.msra.mxu0 %v799_v52 }
 0x7cb   :  { %2187 = vmatprep.subr.bf16.mxu0 %v2397_v19 }
 0x7cc   :  { %v2158_v23 = vpop.f32.mrf.mxu1 }
 0x885   :  { %v694_v24 = vpop.f32.mrf.mxu0 }
 0x886   :  { %v739_v25 = vadd.f32 %v738_v20, %v694_v24  ;;  %v889_v20 = vpack.c.bf16 %v878_v18, %v877_v17  ;;  %v873_v24 = vld [vmem:[#allocation2 + $0x120] sm:$0xff]  ;;  %v986_v18 = vld [vmem:[#allocation2 + $0x190] sm:$0xff] }
 0x887   :  { %v2151_v27 = vpop.f32.mrf.mxu0 }
 0x888   :  { %v745_v28 = vadd.f32 %v739_v25, %v2425_v0  ;;  %2174 = vmatpush3.bf16.msra.mxu1 %v889_v20  ;;  %v874_v25 = vld [vmem:[#allocation2 + $0x128] sm:$0xff]  ;;  %v871_v27 = vld [vmem:[#allocation2 + $0x110] sm:$0xff]  ;;  %v987_v20 = vld [vmem:[#allocation2 + $0x198] sm:$0xff] }
 0x889   :  { %v697_v29 = vpop.f32.mrf.mxu0  ;;  %2175 = vmatprep.subr.bf16.mxu1 %v2397_v19 }
 0x88a   :  { %v2571_v30 = vadd.f32 %v1953_v26, %v745_v28  ;;  %v742_v31 = vadd.f32 %v741_v22, %v697_v29  ;;  %v876_v22 = vld [vmem:[#allocation2 + $0x138] sm:$0xff] }
 0x88b   :  { %v2152_v32 = vpop.f32.mrf.mxu0  ;;  %v888_v23 = vpack.c.bf16 %v876_v22, %v875_v21  ;;  %v872_v28 = vld [vmem:[#allocation2 + $0x118] sm:$0xff]  ;;  %v989_v21 = vpack.c.bf16 %v987_v20, %v986_v18  ;;  %v984_v22 = vld [vmem:[#allocation2 + $0x180] sm:$0xff] }
 0x88c   :  { %v746_v33 = vadd.f32 %v742_v31, %v2430_v1  ;;  %v754_v34 = vsel %vm48_vm0, %v2571_v30, 0.0  ;;  %v886_v29 = vpack.c.bf16 %v872_v28, %v871_v27  ;;  %v869_v31 = vld [vmem:[#allocation2 + $0x100] sm:$0xff]  ;;  %v870_v32 = vld [vmem:[#allocation2 + $0x108] sm:$0xff] }
 0x88d   :  { %755 = vadd.xlane.f32.xlu0 %v754_v34  ;;  %2176 = vmatpush3.bf16.msra.mxu1 %v888_v23  ;;  %v1956_v34 = vld [vmem:[%s2813_s2 + $0x5] ss:$0 sm:$0xff]  ;;  %v985_v23 = vld [vmem:[#allocation2 + $0x188] sm:$0xff] }
 0x88e   :  { %v2576_v35 = vadd.f32 %v1953_v26, %v746_v33  ;;  %v887_v26 = vpack.c.bf16 %v874_v25, %v873_v24  ;;  %2177 = vmatprep.subr.bf16.mxu1 %v2397_v19  ;;  %v885_v33 = vpack.c.bf16 %v870_v32, %v869_v31  ;;  %v988_v24 = vpack.c.bf16 %v985_v23, %v984_v22  ;;  %v1268_v23 = vld [vmem:[#allocation2 + $0x1e0] sm:$0xff] }
 0x890   :  { %v757_v36 = vsel %vm48_vm0, %v2576_v35, 0.0 }
 0x891   :  { %758 = vadd.xlane.f32.xlu1 %v757_v36  ;;  %2178 = vmatpush3.bf16.msra.mxu1 %v887_v26 }
 0x892   :  { %2179 = vmatprep.subr.bf16.mxu1 %v2397_v19 }
 0x895   :  { %2180 = vmatpush3.bf16.msra.mxu1 %v886_v29 }
 0x896   :  { %2181 = vmatprep.subr.bf16.mxu1 %v2397_v19 }
 0x899   :  { %2182 = vmatpush3.bf16.msra.mxu1 %v885_v33 }
 0x89a   :  { %2217 = vmatprep.subr.bf16.mxu1 %v2397_v19 }
 0x916   :  { %v756_v38 = vpop.xlane.xlu0 %755 }
 0x917   :  { %v760_v39 = vmul.f32 0.03125, %v756_v38 }
 0x919   :  { %v762_v0 = vsub.f32 %v2571_v30, %v760_v39 }
 0x91a   :  { %v759_v40 = vpop.xlane.xlu1 %758 }
 0x91b   :  { %v761_v46 = vmul.f32 0.03125, %v759_v40  ;;  %v764_v41 = vmul.f32 %v762_v0, %v762_v0 }
 0x91d   :  { %v763_v42 = vsub.f32 %v2576_v35, %v761_v46  ;;  %v766_v1 = vsel %vm48_vm0, %v764_v41, 0.0 }
 0x91e   :  { %767 = vadd.xlane.f32.xlu0 %v766_v1 }
 0x91f   :  { %v765_v44 = vmul.f32 %v763_v42, %v763_v42 }
 0x921   :  { %v769_v45 = vsel %vm48_vm0, %v765_v44, 0.0 }
 0x922   :  { %770 = vadd.xlane.f32.xlu1 %v769_v45 }
 0x9a7   :  { %v768_v53 = vpop.xlane.xlu0 %767 }
 0x9a8   :  { %v772_v54 = vmul.f32 0.03125, %v768_v53 }
 0x9aa   :  { %v774_v55 = vadd.f32 1e-05, %v772_v54 }
 0x9ab   :  { %v771_v56 = vpop.xlane.xlu1 %770 }
 0x9ac   :  { %2332 = vrsqrt.f32 %v774_v55  ;;  %v773_v57 = vmul.f32 0.03125, %v771_v56 }
 0x9ae   :  { %v775_v58 = vadd.f32 1e-05, %v773_v57 }
 0x9b0   :  { %2334 = vrsqrt.f32 %v775_v58 }
 0x9b9   :  { %v2333_v59 = vpop.eup %2332 }
 0x9ba   :  { %v778_v60 = vmul.f32 %v2333_v59, %v762_v0 }
 0x9bc   :  { %v785_v2 = vmul.f32 %v1954_v61, %v778_v60 }
 0x9bd   :  { %v2335_v62 = vpop.eup %2334 }
 0x9be   :  { %v779_v63 = vmul.f32 %v2335_v62, %v763_v42  ;;  %v792_v5 = vadd.f32 %v1955_v3, %v785_v2  ;;  %v1958_v62 = vld [vmem:[%s2813_s2 + $0x6] ss:$0 sm:$0xff] }
 0x9c0   :  { %v786_v4 = vmul.f32 %v1954_v61, %v779_v63 }
 0x9c2   :  { %v793_v6 = vadd.f32 %v1955_v3, %v786_v4 }
 0x9c4   :  { %v794_v7 = vpack.c.bf16 %v793_v6, %v792_v5 }
 0x9c6   :  { %2164 = vmatmul.mubr.msk.bf16.vlgmr.msra.gmra.mxu0 %vm48_vm0, %v794_v7 }
 0x9c7   :  { %2191 = vmatprep.mubr.msk.bf16.mxu0 %vm2398_vm1, %v2397_v19  ;;  %2188 = vmatpush3.bf16.msra.mxu0 %v989_v21 }
 0x9c8   :  { %2189 = vmatprep.subr.bf16.mxu0 %v2397_v19 }
 0x9cb   :  { %2190 = vmatpush3.bf16.msra.mxu0 %v988_v24  ;;  %v1269_v24 = vld [vmem:[#allocation2 + $0x1e8] sm:$0xff] }
 0x9cc   :  { %2195 = vmatprep.subr.bf16.mxu0 %v2397_v19 }
 0xa86   :  { %v843_v36 = vpop.f32.mrf.mxu0 }
 0xa87   :  { %v844_v38 = vadd.f32 %v1956_v34, %v843_v36 }
 0xa88   :  { %v2165_v39 = vpop.f32.mrf.mxu0 }
 0xa89   :  { %v852_v0 = vmul.f32 0.044715, %v844_v38  ;;  %v850_v55 = vmul.f32 0.5, %v844_v38 }
 0xa8a   :  { %v846_v40 = vpop.f32.mrf.mxu0 }
 0xa8b   :  { %v854_v46 = vmul.f32 %v852_v0, %v844_v38  ;;  %v847_v41 = vadd.f32 %v1956_v34, %v846_v40  ;;  %v1959_v34 = vld [vmem:[%s2813_s2 + $0xd] ss:$0 sm:$0xff]  ;;  %v1960_v0 = vld [vmem:[%s2813_s2 + $0xe] ss:$0 sm:$0xff] }
 0xa8c   :  { %v2166_v42 = vpop.f32.mrf.mxu0 }
 0xa8d   :  { %v856_v1 = vmul.f32 %v854_v46, %v844_v38  ;;  %v853_v44 = vmul.f32 0.044715, %v847_v41  ;;  %v851_v56 = vmul.f32 0.5, %v847_v41  ;;  %v1041_v46 = vld [vmem:[#allocation2 + $0x1b0] sm:$0xff] }
 0xa8f   :  { %v858_v45 = vadd.f32 %v856_v1, %v844_v38  ;;  %v855_v47 = vmul.f32 %v853_v44, %v847_v41 }
 0xa91   :  { %v860_v48 = vmul.f32 0.7978846, %v858_v45  ;;  %v857_v49 = vmul.f32 %v855_v47, %v847_v41  ;;  %v1039_v47 = vld [vmem:[#allocation2 + $0x1a0] sm:$0xff] }
 0xa93   :  { %2336 = vtanh.f32 %v860_v48  ;;  %v859_v50 = vadd.f32 %v857_v49, %v847_v41  ;;  %v1042_v41 = vld [vmem:[#allocation2 + $0x1b8] sm:$0xff]  ;;  %v1040_v48 = vld [vmem:[#allocation2 + $0x1a8] sm:$0xff] }
 0xa94   :  { %v1044_v44 = vpack.c.bf16 %v1042_v41, %v1041_v46  ;;  %v1043_v49 = vpack.c.bf16 %v1040_v48, %v1039_v47 }
 0xa95   :  { %v861_v51 = vmul.f32 0.7978846, %v859_v50  ;;  %v1093_v50 = vld [vmem:[#allocation2 + $0x1d0] sm:$0xff] }
 0xa97   :  { %2338 = vtanh.f32 %v861_v51  ;;  %v1094_v51 = vld [vmem:[#allocation2 + $0x1d8] sm:$0xff] }
 0xaa0   :  { %v2337_v52 = vpop.eup %2336 }
 0xaa1   :  { %v864_v53 = vadd.f32 1.0, %v2337_v52  ;;  %v1096_v52 = vpack.c.bf16 %v1094_v51, %v1093_v50 }
 0xaa3   :  { %v866_v58 = vmul.f32 %v864_v53, %v850_v55  ;;  %v1091_v53 = vld [vmem:[#allocation2 + $0x1c0] sm:$0xff] }
 0xaa4   :  { %v2339_v54 = vpop.eup %2338 }
 0xaa5   :  { %v865_v57 = vadd.f32 1.0, %v2339_v54  ;;  %v1092_v54 = vld [vmem:[#allocation2 + $0x1c8] sm:$0xff] }
 0xaa6   :  { %v1095_v55 = vpack.c.bf16 %v1092_v54, %v1091_v53  ;;  %v1973_v54 = vld [vmem:[%s2813_s2 + $0x19] ss:$0 sm:$0xff] }
 0xaa7   :  { %v867_v59 = vmul.f32 %v865_v57, %v851_v56 }
 0xaa9   :  { %v868_v60 = vpack.c.bf16 %v867_v59, %v866_v58 }
 0xaab   :  { %2184 = vmatmul.mubr.bf16.vlgmr.msra.gmra.mxu1 %v868_v60 }
 0xaac   :  { %2219 = vmatprep.mubr.msk.bf16.mxu1 %vm2398_vm1, %v2397_v19 }
 0xb6b   :  { %v927_v61 = vpop.f32.mrf.mxu1 }
 0xb6c   :  { %v934_v63 = vadd.f32 %v927_v61, %v2571_v30  ;;  %v1963_v61 = vld [vmem:[%s2813_s2 + $0x15] ss:$0 sm:$0xff] }
 0xb6d   :  { %v2185_v2 = vpop.f32.mrf.mxu1 }
 0xb6e   :  { %v2612_v3 = vadd.f32 %v1958_v62, %v934_v63 }
 0xb6f   :  { %v930_v4 = vpop.f32.mrf.mxu1 }
 0xb70   :  { %v935_v5 = vadd.f32 %v930_v4, %v2576_v35  ;;  %v943_v6 = vsel %vm48_vm0, %v2612_v3, 0.0 }
 0xb71   :  { %944 = vadd.xlane.f32.xlu0 %v943_v6  ;;  %v2186_v7 = vpop.f32.mrf.mxu1 }
 0xb72   :  { %v2617_v8 = vadd.f32 %v1958_v62, %v935_v5 }
 0xb74   :  { %v946_v9 = vsel %vm48_vm0, %v2617_v8, 0.0 }
 0xb75   :  { %947 = vadd.xlane.f32.xlu1 %v946_v9 }
 0xbfa   :  { %v945_v10 = vpop.xlane.xlu0 %944 }
 0xbfb   :  { %v949_v11 = vmul.f32 0.03125, %v945_v10  ;;  %v1961_v10 = vld [vmem:[%s2813_s2 + $0x14] ss:$0 sm:$0xff] }
 0xbfd   :  { %v951_v30 = vsub.f32 %v2612_v3, %v949_v11  ;;  %v1965_v11 = vld [vmem:[%s2813_s2 + $0x16] ss:$0 sm:$0xff] }
 0xbfe   :  { %v948_v12 = vpop.xlane.xlu1 %947 }
 0xbff   :  { %v950_v13 = vmul.f32 0.03125, %v948_v12  ;;  %v953_v14 = vmul.f32 %v951_v30, %v951_v30 }
 0xc01   :  { %v952_v35 = vsub.f32 %v2617_v8, %v950_v13  ;;  %v955_v15 = vsel %vm48_vm0, %v953_v14, 0.0  ;;  %v1270_v13 = vld [vmem:[#allocation2 + $0x1f0] sm:$0xff]  ;;  %v1271_v14 = vld [vmem:[#allocation2 + $0x1f8] sm:$0xff] }
 0xc02   :  { %956 = vadd.xlane.f32.xlu0 %v955_v15  ;;  %v1273_v20 = vpack.c.bf16 %v1271_v14, %v1270_v13  ;;  %v1322_v13 = vld [vmem:[#allocation2 + $0x210] sm:$0xff]  ;;  %v1323_v14 = vld [vmem:[#allocation2 + $0x218] sm:$0xff] }
 0xc03   :  { %v954_v16 = vmul.f32 %v952_v35, %v952_v35 }
 0xc05   :  { %v958_v17 = vsel %vm48_vm0, %v954_v16, 0.0 }
 0xc06   :  { %959 = vadd.xlane.f32.xlu1 %v958_v17 }
 0xc8b   :  { %v957_v25 = vpop.xlane.xlu0 %956 }
 0xc8c   :  { %v961_v26 = vmul.f32 0.03125, %v957_v25  ;;  %v1272_v25 = vpack.c.bf16 %v1269_v24, %v1268_v23 }
 0xc8e   :  { %v963_v27 = vadd.f32 1e-05, %v961_v26  ;;  %v1374_v26 = vld [vmem:[#allocation2 + $0x230] sm:$0xff] }
 0xc8f   :  { %v960_v28 = vpop.xlane.xlu1 %959 }
 0xc90   :  { %2340 = vrsqrt.f32 %v963_v27  ;;  %v962_v29 = vmul.f32 0.03125, %v960_v28  ;;  %v1375_v27 = vld [vmem:[#allocation2 + $0x238] sm:$0xff] }
 0xc91   :  { %v1377_v28 = vpack.c.bf16 %v1375_v27, %v1374_v26 }
 0xc92   :  { %v964_v31 = vadd.f32 1e-05, %v962_v29  ;;  %v1372_v29 = vld [vmem:[#allocation2 + $0x220] sm:$0xff] }
 0xc94   :  { %2342 = vrsqrt.f32 %v964_v31  ;;  %v1373_v31 = vld [vmem:[#allocation2 + $0x228] sm:$0xff] }
 0xc9d   :  { %v2341_v32 = vpop.eup %2340 }
 0xc9e   :  { %v967_v33 = vmul.f32 %v2341_v32, %v951_v30  ;;  %v1376_v32 = vpack.c.bf16 %v1373_v31, %v1372_v29  ;;  %v1971_v29 = vld [vmem:[%s2813_s2 + $0x18] ss:$0 sm:$0xff] }
 0xca0   :  { %v974_v38 = vmul.f32 %v1959_v34, %v967_v33 }
 0xca1   :  { %v2343_v36 = vpop.eup %2342 }
 0xca2   :  { %v968_v39 = vmul.f32 %v2343_v36, %v952_v35  ;;  %v981_v42 = vadd.f32 %v1960_v0, %v974_v38 }
 0xca4   :  { %v975_v40 = vmul.f32 %v1959_v34, %v968_v39 }
 0xca6   :  { %v982_v1 = vadd.f32 %v1960_v0, %v975_v40 }
 0xca8   :  { %v2633_v45 = vpack.c.bf16 %v982_v1, %v981_v42 }
 0xcaa   :  { %2192 = vmatmul.mubr.msk.bf16.vlgmr.msra.gmra.mxu0 %vm48_vm0, %v2633_v45 }
 0xcab   :  { %2196 = vmatpush3.bf16.msra.mxu0 %v1044_v44  ;;  %2199 = vmatprep.mubr.msk.bf16.mxu0 %vm2398_vm1, %v2397_v19  ;;  %v1969_v44 = vld [vmem:[%s2813_s2 + $0x17] ss:$0 sm:$0xff] }
 0xcac   :  { %2197 = vmatprep.subr.bf16.mxu0 %v2397_v19 }
 0xcaf   :  { %2198 = vmatpush3.bf16.msra.mxu0 %v1043_v49 }
 0xcb0   :  { %2203 = vmatprep.subr.bf16.mxu0 %v2397_v19 }
 0xcb2   :  { %2200 = vmatmul.mubr.msk.bf16.vlgmr.msra.gmra.mxu0 %vm48_vm0, %v2633_v45 }
 0xcb3   :  { %2204 = vmatpush3.bf16.msra.mxu0 %v1096_v52  ;;  %2207 = vmatprep.mubr.msk.bf16.mxu0 %vm2398_vm1, %v2397_v19 }
 0xcb4   :  { %2205 = vmatprep.subr.bf16.mxu0 %v2397_v19 }
 0xcb7   :  { %2206 = vmatpush3.bf16.msra.mxu0 %v1095_v55 }
 0xcb8   :  { %2211 = vmatprep.subr.bf16.mxu0 %v2397_v19 }
 0xcba   :  { %2208 = vmatmul.mubr.msk.bf16.vlgmr.msra.gmra.mxu0 %vm48_vm0, %v2633_v45 }
 0xcbb   :  { %2213 = vmatprep.mubr.msk.bf16.mxu0 %vm2398_vm1, %v2397_v19 }
 0xd6a   :  { %v1032_v56 = vpop.f32.mrf.mxu0 }
 0xd6b   :  { %v1033_v15 = vadd.f32 %v1961_v10, %v1032_v56 }
 0xd6c   :  { %v2193_v57 = vpop.f32.mrf.mxu0 }
 0xd6e   :  { %v1035_v58 = vpop.f32.mrf.mxu0 }
 0xd6f   :  { %v1036_v12 = vadd.f32 %v1961_v10, %v1035_v58 }
 0xd70   :  { %v2194_v59 = vpop.f32.mrf.mxu0 }
 0xd71   :  { %v1143_v21 = vpack.c.bf16 %v1036_v12, %v1033_v15 }
 0xd72   :  { %v1084_v60 = vpop.f32.mrf.mxu0 }
 0xd73   :  { %v1085_v2 = vadd.f32 %v1963_v61, %v1084_v60 }
 0xd74   :  { %v2201_v62 = vpop.f32.mrf.mxu0 }
 0xd76   :  { %v1087_v63 = vpop.f32.mrf.mxu0 }
 0xd77   :  { %v1088_v4 = vadd.f32 %v1963_v61, %v1087_v63 }
 0xd78   :  { %v2202_v5 = vpop.f32.mrf.mxu0 }
 0xd79   :  { %v1144_v6 = vpack.c.bf16 %v1088_v4, %v1085_v2 }
 0xd7a   :  { %v1136_v7 = vpop.f32.mrf.mxu0 }
 0xd7b   :  { %v1149_v9 = vsel %vm252_vm2, %v1144_v6, 0  ;;  %v1137_v16 = vadd.f32 %v1965_v11, %v1136_v7 }
 0xd7c   :  { %v2209_v30 = vpop.f32.mrf.mxu0  ;;  %2212 = vmatpush3.bf16.xpose.msra.mxu0 %v1149_v9 }
 0xd7d   :  { %2223 = vmatprep.subr.bf16.mxu0 %v2397_v19 }
 0xd7e   :  { %v1139_v35 = vpop.f32.mrf.mxu0 }
 0xd7f   :  { %v1140_v17 = vadd.f32 %v1965_v11, %v1139_v35 }
 0xd80   :  { %v2210_v18 = vpop.f32.mrf.mxu0 }
 0xd81   :  { %v1219_v22 = vpack.c.bf16 %v1140_v17, %v1137_v16  ;;  %v1325_v17 = vpack.c.bf16 %v1323_v14, %v1322_v13 }
 0xd83   :  { %2214 = vmatmul.mubr.msk.bf16.vlgmr.msra.gmra.mxu0 %vm252_vm2, %v1143_v21  ;;  %2218 = vmatpush3.bf16.msra.mxu1 %v1219_v22  ;;  %v1321_v21 = vld [vmem:[#allocation2 + $0x208] sm:$0xff] }
 0xd84   :  { %2224 = vmatpush3.bf16.msra.mxu0 %v1273_v20  ;;  %2227 = vmatprep.mubr.msk.bf16.mxu0 %vm2398_vm1, %v2397_v19  ;;  %v1320_v20 = vld [vmem:[#allocation2 + $0x200] sm:$0xff] }
 0xd85   :  { %2225 = vmatprep.subr.bf16.mxu0 %v2397_v19  ;;  %2231 = vmatprep.subr.bf16.mxu1 %v2397_v19  ;;  %v1324_v22 = vpack.c.bf16 %v1321_v21, %v1320_v20  ;;  %v1979_v20 = vld [vmem:[%s2813_s2 + $0x11] ss:$0 sm:$0xff] }
 0xd88   :  { %2226 = vmatpush3.bf16.msra.mxu0 %v1272_v25 }
 0xd89   :  { %2239 = vmatprep.subr.bf16.mxu0 %v2397_v19 }
 0xd8b   :  { %2228 = vmatmul.mubr.msk.bf16.vlgmr.msra.gmra.mxu0 %vm48_vm0, %v2633_v45 }
 0xd8c   :  { %2240 = vmatpush3.bf16.msra.mxu0 %v1377_v28  ;;  %2243 = vmatprep.mubr.msk.bf16.mxu0 %vm2398_vm1, %v2397_v19 }
 0xd8d   :  { %2241 = vmatprep.subr.bf16.mxu0 %v2397_v19 }
 0xd90   :  { %2242 = vmatpush3.bf16.msra.mxu0 %v1376_v32 }
 0xd91   :  { %2253 = vmatprep.subr.bf16.mxu0 %v2397_v19 }
 0xd93   :  { %2244 = vmatmul.mubr.msk.bf16.vlgmr.msra.gmra.mxu0 %vm48_vm0, %v2633_v45 }
 0xd94   :  { %2255 = vmatprep.mubr.msk.bf16.mxu0 %vm2398_vm1, %v2397_v19 }
 0xe43   :  { %v1185_v33 = vpop.f32.mrf.mxu0 }
 0xe44   :  { %v1192_v34 = vmul.f32 0.25, %v1185_v33 }
 0xe45   :  { %v2215_v36 = vpop.f32.mrf.mxu0 }
 0xe46   :  { %v1194_v38 = vsel %vm2499_vm5, %v1192_v34, -1e+30 }
 0xe47   :  { %v1188_v39 = vpop.f32.mrf.mxu0  ;;  %v1196_v0 = vsel %vm252_vm2, %v1194_v38, -inf }
 0xe48   :  { %v1193_v40 = vmul.f32 0.25, %v1188_v39  ;;  %1197 = vmax.xlane.f32.xlu0 %v1196_v0 }
 0xe49   :  { %v2216_v46 = vpop.f32.mrf.mxu0 }
 0xe4a   :  { %v1195_v41 = vsel %vm2506_vm8, %v1193_v40, -1e+30 }
 0xe4b   :  { %v1313_v42 = vpop.f32.mrf.mxu0  ;;  %v1199_v1 = vsel %vm252_vm2, %v1195_v41, -inf }
 0xe4c   :  { %1200 = vmax.xlane.f32.xlu1 %v1199_v1  ;;  %v2687_v49 = vadd.f32 %v1969_v44, %v1313_v42 }
 0xe4d   :  { %v2229_v47 = vpop.f32.mrf.mxu0 }
 0xe4f   :  { %v1316_v48 = vpop.f32.mrf.mxu0 }
 0xe50   :  { %v2689_v50 = vadd.f32 %v1969_v44, %v1316_v48 }
 0xe51   :  { %v2230_v51 = vpop.f32.mrf.mxu0 }
 0xe52   :  { %v1424_v52 = vpack.c.bf16 %v2689_v50, %v2687_v49 }
 0xe53   :  { %v1417_v53 = vpop.f32.mrf.mxu0 }
 0xe54   :  { %v1418_v57 = vadd.f32 %v1973_v54, %v1417_v53 }
 0xe55   :  { %v2245_v55 = vpop.f32.mrf.mxu0 }
 0xe57   :  { %v1420_v56 = vpop.f32.mrf.mxu0 }
 0xe58   :  { %v1421_v58 = vadd.f32 %v1973_v54, %v1420_v56 }
 0xe59   :  { %v2246_v59 = vpop.f32.mrf.mxu0 }
 0xe5a   :  { %v1500_v60 = vpack.c.bf16 %v1421_v58, %v1418_v57 }
 0xe5c   :  { %2254 = vmatpush3.bf16.msra.mxu0 %v1500_v60  ;;  %v1264_v60 = vld [vmem:[#allocation2 + $0x240] sm:$0xff] }
 0xe5d   :  { %2265 = vmatprep.subr.bf16.mxu0 %v2397_v19 }
 0xed1   :  { %v1198_v61 = vpop.xlane.xlu0 %1197 }
 0xed2   :  { %v1202_v62 = vsub.f32 %v1194_v38, %v1198_v61  ;;  %v1265_v61 = vld [vmem:[#allocation2 + $0x248] sm:$0xff] }
 0xed4   :  { %v1204_v63 = vmul.f32 1.442695, %v1202_v62 }
 0xed5   :  { %v1201_v2 = vpop.xlane.xlu1 %1200 }
 0xed6   :  { %2344 = vpow2.f32 %v1204_v63  ;;  %v1203_v4 = vsub.f32 %v1195_v41, %v1201_v2 }
 0xed8   :  { %v1206_v5 = vmul.f32 1.442695, %v1203_v4  ;;  %v1266_v4 = vpack.c.bf16 %v1265_v61, %v1264_v60 }
 0xeda   :  { %2346 = vpow2.f32 %v1206_v5 }
 0xee3   :  { %v2345_v6 = vpop.eup %2344 }
 0xee4   :  { %v1208_v7 = vsel %vm252_vm2, %v2345_v6, 0.0 }
 0xee5   :  { %1209 = vadd.xlane.f32.xlu0 %v1208_v7  ;;  %v1546_v7 = vld [vmem:[#allocation2 + $0x258] sm:$0xff] }
 0xee7   :  { %v2347_v9 = vpop.eup %2346 }
 0xee8   :  { %v1211_v10 = vsel %vm252_vm2, %v2347_v9, 0.0 }
 0xee9   :  { %1212 = vadd.xlane.f32.xlu1 %v1211_v10 }
 0xf6e   :  { %v1210_v11 = vpop.xlane.xlu0 %1209 }
 0xf6f   :  { %2348 = vrcp.f32 %v1210_v11 }
 0xf72   :  { %v1213_v30 = vpop.xlane.xlu1 %1212 }
 0xf73   :  { %2350 = vrcp.f32 %v1213_v30 }
 0xf7c   :  { %v2349_v12 = vpop.eup %2348 }
 0xf7d   :  { %v1216_v15 = vmul.f32 %v2349_v12, %v2345_v6  ;;  %v1545_v6 = vld [vmem:[#allocation2 + $0x250] sm:$0xff] }
 0xf80   :  { %v2351_v35 = vpop.eup %2350 }
 0xf81   :  { %v1217_v16 = vmul.f32 %v2351_v35, %v2347_v9  ;;  %v1547_v9 = vpack.c.bf16 %v1546_v7, %v1545_v6  ;;  %v1771_v7 = vld [vmem:[#allocation2 + $0x2d0] sm:$0xff] }
 0xf83   :  { %v1218_v18 = vpack.c.bf16 %v1217_v16, %v1216_v15 }
 0xf85   :  { %2220 = vmatmul.mubr.msk.bf16.vlgmr.msra.gmra.mxu1 %vm252_vm2, %v1218_v18 }
 0xf86   :  { %2232 = vmatpush3.bf16.msra.mxu1 %v1325_v17  ;;  %2235 = vmatprep.mubr.msk.bf16.mxu1 %vm2398_vm1, %v2397_v19 }
 0xf87   :  { %2233 = vmatprep.subr.bf16.mxu1 %v2397_v19 }
 0xf8a   :  { %2234 = vmatpush3.bf16.msra.mxu1 %v1324_v22 }
 0xf8b   :  { %2247 = vmatprep.subr.bf16.mxu1 %v2397_v19 }
 0xf8d   :  { %2236 = vmatmul.mubr.msk.bf16.vlgmr.msra.gmra.mxu1 %vm48_vm0, %v2633_v45 }
 0xf8e   :  { %2249 = vmatprep.mubr.msk.bf16.mxu1 %vm2398_vm1, %v2397_v19 }
0x1045   :  { %v1257_v23 = vpop.f32.mrf.mxu1 }
0x1047   :  { %v2221_v24 = vpop.f32.mrf.mxu1 }
0x1049   :  { %v1260_v25 = vpop.f32.mrf.mxu1 }
0x104a   :  { %v1267_v26 = vpack.c.bf16 %v1260_v25, %v1257_v23 }
0x104b   :  { %v2222_v27 = vpop.f32.mrf.mxu1 }
0x104d   :  { %v1365_v28 = vpop.f32.mrf.mxu1 }
0x104e   :  { %v1366_v33 = vadd.f32 %v1971_v29, %v1365_v28 }
0x104f   :  { %v2237_v31 = vpop.f32.mrf.mxu1 }
0x1051   :  { %v1368_v32 = vpop.f32.mrf.mxu1 }
0x1052   :  { %v1369_v34 = vadd.f32 %v1971_v29, %v1368_v32 }
0x1053   :  { %v2238_v36 = vpop.f32.mrf.mxu1 }
0x1054   :  { %v1425_v38 = vpack.c.bf16 %v1369_v34, %v1366_v33 }
0x1056   :  { %v1430_v45 = vsel %vm252_vm2, %v1425_v38, 0 }
0x1057   :  { %2248 = vmatpush3.bf16.xpose.msra.mxu1 %v1430_v45 }
0x1058   :  { %2259 = vmatprep.subr.bf16.mxu1 %v2397_v19 }
0x105e   :  { %2250 = vmatmul.mubr.msk.bf16.vlgmr.msra.gmra.mxu1 %vm252_vm2, %v1424_v52 }
0x105f   :  { %2261 = vmatprep.mubr.msk.bf16.mxu1 %vm2398_vm1, %v2397_v19  ;;  %2260 = vmatpush3.bf16.msra.mxu1 %v1547_v9  ;;  %v1772_v9 = vld [vmem:[#allocation2 + $0x2d8] sm:$0xff] }
0x1060   :  { %2271 = vmatprep.subr.bf16.mxu1 %v2397_v19 }
0x111e   :  { %v1466_v39 = vpop.f32.mrf.mxu1 }
0x111f   :  { %v1473_v0 = vmul.f32 0.25, %v1466_v39 }
0x1120   :  { %v2251_v40 = vpop.f32.mrf.mxu1 }
0x1121   :  { %v1475_v46 = vsel %vm2499_vm5, %v1473_v0, -1e+30  ;;  %v1689_v40 = vld [vmem:[#allocation2 + $0x270] sm:$0xff] }
0x1122   :  { %v1469_v41 = vpop.f32.mrf.mxu1  ;;  %v1477_v42 = vsel %vm252_vm2, %v1475_v46, -inf }
0x1123   :  { %v1474_v1 = vmul.f32 0.25, %v1469_v41  ;;  %1478 = vmax.xlane.f32.xlu0 %v1477_v42  ;;  %v1687_v42 = vld [vmem:[#allocation2 + $0x260] sm:$0xff] }
0x1124   :  { %v2252_v44 = vpop.f32.mrf.mxu1 }
0x1125   :  { %v1476_v47 = vsel %vm2506_vm8, %v1474_v1, -1e+30  ;;  %v1688_v1 = vld [vmem:[#allocation2 + $0x268] sm:$0xff] }
0x1126   :  { %v1480_v48 = vsel %vm252_vm2, %v1476_v47, -inf  ;;  %v1691_v44 = vpack.c.bf16 %v1688_v1, %v1687_v42 }
0x1127   :  { %1481 = vmax.xlane.f32.xlu1 %v1480_v48 }
0x11ac   :  { %v1479_v49 = vpop.xlane.xlu0 %1478 }
0x11ad   :  { %v1483_v50 = vsub.f32 %v1475_v46, %v1479_v49  ;;  %v1690_v46 = vld [vmem:[#allocation2 + $0x278] sm:$0xff] }
0x11ae   :  { %v1692_v41 = vpack.c.bf16 %v1690_v46, %v1689_v40 }
0x11af   :  { %v1485_v51 = vmul.f32 1.442695, %v1483_v50 }
0x11b0   :  { %v1482_v52 = vpop.xlane.xlu1 %1481 }
0x11b1   :  { %2352 = vpow2.f32 %v1485_v51  ;;  %v1484_v53 = vsub.f32 %v1476_v47, %v1482_v52 }
0x11b3   :  { %v1487_v37 = vmul.f32 1.442695, %v1484_v53 }
0x11b5   :  { %2354 = vpow2.f32 %v1487_v37 }
0x11be   :  { %v2353_v54 = vpop.eup %2352 }
0x11bf   :  { %v1489_v55 = vsel %vm252_vm2, %v2353_v54, 0.0 }
0x11c0   :  { %1490 = vadd.xlane.f32.xlu0 %v1489_v55 }
0x11c2   :  { %v2355_v56 = vpop.eup %2354 }
0x11c3   :  { %v1492_v57 = vsel %vm252_vm2, %v2355_v56, 0.0 }
0x11c4   :  { %1493 = vadd.xlane.f32.xlu1 %v1492_v57 }
0x1249   :  { %v1491_v43 = vpop.xlane.xlu0 %1490 }
0x124a   :  { %2356 = vrcp.f32 %v1491_v43  ;;  %v1981_v43 = vld [vmem:[%s2813_s2 + $0x10] ss:$0 sm:$0xff] }
0x124d   :  { %v1494_v58 = vpop.xlane.xlu1 %1493 }
0x124e   :  { %2358 = vrcp.f32 %v1494_v58 }
0x1257   :  { %v2357_v59 = vpop.eup %2356 }
0x1258   :  { %v1497_v63 = vmul.f32 %v2357_v59, %v2353_v54  ;;  %v1980_v54 = vld [vmem:[%s2813_s2 + $0xf] ss:$0 sm:$0xff] }
0x125b   :  { %v2359_v62 = vpop.eup %2358 }
0x125c   :  { %v1498_v2 = vmul.f32 %v2359_v62, %v2355_v56  ;;  %v1775_v62 = vld [vmem:[#allocation2 + $0x2f0] sm:$0xff] }
0x125e   :  { %v1499_v5 = vpack.c.bf16 %v1498_v2, %v1497_v63  ;;  %v1776_v63 = vld [vmem:[#allocation2 + $0x2f8] sm:$0xff] }
0x125f   :  { %v1784_v2 = vpack.c.bf16 %v1776_v63, %v1775_v62 }
0x1260   :  { %2256 = vmatmul.mubr.msk.bf16.vlgmr.msra.gmra.mxu0 %vm252_vm2, %v1499_v5  ;;  %v1774_v5 = vld [vmem:[#allocation2 + $0x2e8] sm:$0xff] }
0x1261   :  { %2266 = vmatpush3.bf16.msra.mxu0 %v1266_v4  ;;  %2267 = vmatprep.mubr.msk.bf16.mxu0 %vm2398_vm1, %v2397_v19  ;;  %v1773_v4 = vld [vmem:[#allocation2 + $0x2e0] sm:$0xff] }
0x1262   :  { %2279 = vmatprep.subr.bf16.mxu0 %v2397_v19  ;;  %v1783_v6 = vpack.c.bf16 %v1774_v5, %v1773_v4 }
0x1268   :  { %2268 = vmatmul.mubr.msk.bf16.vlgmr.msra.gmra.mxu0 %vm252_vm2, %v1267_v26 }
0x1269   :  { %2295 = vmatprep.mubr.msk.bf16.mxu0 %vm2398_vm1, %v2397_v19  ;;  %2280 = vmatpush3.bf16.msra.mxu0 %v1784_v2 }
0x126a   :  { %2281 = vmatprep.subr.bf16.mxu0 %v2397_v19 }
0x126d   :  { %2282 = vmatpush3.bf16.msra.mxu0 %v1783_v6 }
0x126e   :  { %2283 = vmatprep.subr.bf16.mxu0 %v2397_v19 }
0x1320   :  { %v1538_v10 = vpop.f32.mrf.mxu0 }
0x1322   :  { %v2257_v11 = vpop.f32.mrf.mxu0 }
0x1323   :  { %v1769_v11 = vld [vmem:[#allocation2 + $0x2c0] sm:$0xff] }
0x1324   :  { %v1541_v30 = vpop.f32.mrf.mxu0 }
0x1325   :  { %v1548_v12 = vpack.c.bf16 %v1541_v30, %v1538_v10  ;;  %v1782_v10 = vpack.c.bf16 %v1772_v9, %v1771_v7  ;;  %v1770_v30 = vld [vmem:[#allocation2 + $0x2c8] sm:$0xff] }
0x1326   :  { %v2258_v13 = vpop.f32.mrf.mxu0 }
0x1327   :  { %2262 = vmatmul.mubr.msk.bf16.vlgmr.msra.gmra.mxu1 %vm252_vm2, %v1548_v12  ;;  %2284 = vmatpush3.bf16.msra.mxu0 %v1782_v10  ;;  %v1781_v12 = vpack.c.bf16 %v1770_v30, %v1769_v11  ;;  %v1767_v13 = vld [vmem:[#allocation2 + $0x2b0] sm:$0xff]  ;;  %v1879_v11 = vld [vmem:[%s2813_s2 + $0x38] sm:$0xff] }
0x1328   :  { %v1630_v14 = vpop.f32.mrf.mxu0  ;;  %2275 = vmatprep.mubr.msk.bf16.mxu1 %vm2398_vm1, %v2397_v19  ;;  %2272 = vmatpush3.bf16.msra.mxu1 %v1692_v41  ;;  %v1878_v10 = vld [vmem:[%s2813_s2 + $0x30] sm:$0xff] }
0x1329   :  { %2273 = vmatprep.subr.bf16.mxu1 %v2397_v19  ;;  %2285 = vmatprep.subr.bf16.mxu0 %v2397_v19  ;;  %v1881_v30 = vpack.c.bf16 %v1879_v11, %v1878_v10 }
0x132a   :  { %v2269_v35 = vpop.f32.mrf.mxu0 }
0x132b   :  { %2286 = vmatpush3.bf16.msra.mxu0 %v1781_v12  ;;  %v1876_v12 = vld [vmem:[%s2813_s2 + $0x20] sm:$0xff] }
0x132c   :  { %v1633_v15 = vpop.f32.mrf.mxu0  ;;  %2274 = vmatpush3.bf16.msra.mxu1 %v1691_v44  ;;  %2287 = vmatprep.subr.bf16.mxu0 %v2397_v19 }
0x132d   :  { %2299 = vmatprep.subr.bf16.mxu1 %v2397_v19 }
0x132e   :  { %v2270_v16 = vpop.f32.mrf.mxu0 }
0x132f   :  { %v1766_v16 = vld [vmem:[#allocation2 + $0x2a8] sm:$0xff] }
0x13e7   :  { %v1586_v17 = vpop.f32.mrf.mxu1 }
0x13e8   :  { %v1631_v18 = vadd.f32 %v1630_v14, %v1586_v17  ;;  %v1768_v14 = vld [vmem:[#allocation2 + $0x2b8] sm:$0xff] }
0x13e9   :  { %v2263_v21 = vpop.f32.mrf.mxu1  ;;  %v1780_v35 = vpack.c.bf16 %v1768_v14, %v1767_v13  ;;  %v1877_v13 = vld [vmem:[%s2813_s2 + $0x28] sm:$0xff] }
0x13ea   :  { %v1637_v22 = vadd.f32 %v1631_v18, %v2612_v3  ;;  %v1763_v18 = vld [vmem:[#allocation2 + $0x290] sm:$0xff]  ;;  %v1880_v14 = vpack.c.bf16 %v1877_v13, %v1876_v12 }
0x13eb   :  { %v1589_v23 = vpop.f32.mrf.mxu1  ;;  %2288 = vmatpush3.bf16.msra.mxu0 %v1780_v35 }
0x13ec   :  { %v2742_v24 = vadd.f32 %v1979_v20, %v1637_v22  ;;  %v1634_v25 = vadd.f32 %v1633_v15, %v1589_v23  ;;  %v1765_v15 = vld [vmem:[#allocation2 + $0x2a0] sm:$0xff]  ;;  %2289 = vmatprep.subr.bf16.mxu0 %v2397_v19  ;;  %v1762_v23 = vld [vmem:[#allocation2 + $0x288] sm:$0xff] }
0x13ed   :  { %v2264_v26 = vpop.f32.mrf.mxu1  ;;  %v1779_v17 = vpack.c.bf16 %v1766_v16, %v1765_v15  ;;  %v1761_v22 = vld [vmem:[#allocation2 + $0x280] sm:$0xff] }
0x13ee   :  { %v1638_v27 = vadd.f32 %v1634_v25, %v2617_v8  ;;  %v1646_v28 = vsel %vm48_vm0, %v2742_v24, 0.0  ;;  %v1777_v25 = vpack.c.bf16 %v1762_v23, %v1761_v22  ;;  %v1982_v26 = vld [vmem:[%s2813_s2 + $0x12] ss:$0 sm:$0xff]  ;;  %v1985_v23 = vld [vmem:[%s2813_s2 + $0x1a] ss:$0 sm:$0xff] }
0x13ef   :  { %1647 = vadd.xlane.f32.xlu0 %v1646_v28  ;;  %2290 = vmatpush3.bf16.msra.mxu0 %v1779_v17 }
0x13f0   :  { %v2747_v29 = vadd.f32 %v1979_v20, %v1638_v27  ;;  %v1764_v20 = vld [vmem:[#allocation2 + $0x298] sm:$0xff]  ;;  %2291 = vmatprep.subr.bf16.mxu0 %v2397_v19 }
0x13f1   :  { %v1778_v21 = vpack.c.bf16 %v1764_v20, %v1763_v18 }
0x13f2   :  { %v1649_v31 = vsel %vm48_vm0, %v2747_v29, 0.0 }
0x13f3   :  { %1650 = vadd.xlane.f32.xlu1 %v1649_v31  ;;  %2292 = vmatpush3.bf16.msra.mxu0 %v1778_v21 }
0x13f4   :  { %2293 = vmatprep.subr.bf16.mxu0 %v2397_v19 }
0x13f7   :  { %2294 = vmatpush3.bf16.msra.mxu0 %v1777_v25 }
0x1478   :  { %v1648_v32 = vpop.xlane.xlu0 %1647 }
0x1479   :  { %v1652_v33 = vmul.f32 0.03125, %v1648_v32 }
0x147b   :  { %v1654_v3 = vsub.f32 %v2742_v24, %v1652_v33 }
0x147c   :  { %v1651_v34 = vpop.xlane.xlu1 %1650 }
0x147d   :  { %v1653_v36 = vmul.f32 0.03125, %v1651_v34  ;;  %v1656_v38 = vmul.f32 %v1654_v3, %v1654_v3 }
0x147f   :  { %v1655_v45 = vsub.f32 %v2747_v29, %v1653_v36  ;;  %v1658_v8 = vsel %vm48_vm0, %v1656_v38, 0.0 }
0x1480   :  { %1659 = vadd.xlane.f32.xlu0 %v1658_v8 }
0x1481   :  { %v1657_v39 = vmul.f32 %v1655_v45, %v1655_v45 }
0x1483   :  { %v1661_v0 = vsel %vm48_vm0, %v1657_v39, 0.0 }
0x1484   :  { %1662 = vadd.xlane.f32.xlu1 %v1661_v0 }
0x1509   :  { %v1660_v47 = vpop.xlane.xlu0 %1659 }
0x150a   :  { %v1664_v48 = vmul.f32 0.03125, %v1660_v47 }
0x150c   :  { %v1666_v49 = vadd.f32 1e-05, %v1664_v48 }
0x150d   :  { %v1663_v50 = vpop.xlane.xlu1 %1662 }
0x150e   :  { %2360 = vrsqrt.f32 %v1666_v49  ;;  %v1665_v51 = vmul.f32 0.03125, %v1663_v50 }
0x1510   :  { %v1667_v52 = vadd.f32 1e-05, %v1665_v51 }
0x1512   :  { %2362 = vrsqrt.f32 %v1667_v52 }
0x151b   :  { %v2361_v53 = vpop.eup %2360 }
0x151c   :  { %v1670_v37 = vmul.f32 %v2361_v53, %v1654_v3 }
0x151e   :  { %v1677_v57 = vmul.f32 %v1980_v54, %v1670_v37  ;;  %v1984_v37 = vld [vmem:[%s2813_s2 + $0x13] ss:$0 sm:$0xff] }
0x151f   :  { %v2363_v55 = vpop.eup %2362 }
0x1520   :  { %v1671_v56 = vmul.f32 %v2363_v55, %v1655_v45  ;;  %v1684_v59 = vadd.f32 %v1981_v43, %v1677_v57 }
0x1522   :  { %v1678_v58 = vmul.f32 %v1980_v54, %v1671_v56 }
0x1524   :  { %v1685_v60 = vadd.f32 %v1981_v43, %v1678_v58 }
0x1526   :  { %v1686_v61 = vpack.c.bf16 %v1685_v60, %v1684_v59 }
0x1528   :  { %2276 = vmatmul.mubr.msk.bf16.vlgmr.msra.gmra.mxu1 %vm48_vm0, %v1686_v61 }
0x1529   :  { %2303 = vmatprep.mubr.msk.bf16.mxu1 %vm2398_vm1, %v2397_v19  ;;  %2300 = vmatpush3.bf16.msra.mxu1 %v1881_v30 }
0x152a   :  { %2301 = vmatprep.subr.bf16.mxu1 %v2397_v19  ;;  %v1986_v19 = vld [vmem:[%s2813_s2 + $0x1b] ss:$0 sm:$0xff] }
0x152d   :  { %2302 = vmatpush3.bf16.msra.mxu1 %v1880_v14 }
0x15e8   :  { %v1735_v27 = vpop.f32.mrf.mxu1 }
0x15e9   :  { %v1736_v28 = vadd.f32 %v1982_v26, %v1735_v27 }
0x15ea   :  { %v2277_v31 = vpop.f32.mrf.mxu1 }
0x15eb   :  { %v1744_v32 = vmul.f32 0.044715, %v1736_v28  ;;  %v1742_v47 = vmul.f32 0.5, %v1736_v28 }
0x15ec   :  { %v1738_v33 = vpop.f32.mrf.mxu1 }
0x15ed   :  { %v1746_v3 = vmul.f32 %v1744_v32, %v1736_v28  ;;  %v1739_v34 = vadd.f32 %v1982_v26, %v1738_v33 }
0x15ee   :  { %v2278_v36 = vpop.f32.mrf.mxu1 }
0x15ef   :  { %v1748_v38 = vmul.f32 %v1746_v3, %v1736_v28  ;;  %v1745_v45 = vmul.f32 0.044715, %v1739_v34  ;;  %v1743_v48 = vmul.f32 0.5, %v1739_v34 }
0x15f1   :  { %v1750_v8 = vadd.f32 %v1748_v38, %v1736_v28  ;;  %v1747_v39 = vmul.f32 %v1745_v45, %v1739_v34 }
0x15f3   :  { %v1752_v0 = vmul.f32 0.7978846, %v1750_v8  ;;  %v1749_v40 = vmul.f32 %v1747_v39, %v1739_v34 }
0x15f5   :  { %2364 = vtanh.f32 %v1752_v0  ;;  %v1751_v46 = vadd.f32 %v1749_v40, %v1739_v34 }
0x15f7   :  { %v1753_v41 = vmul.f32 0.7978846, %v1751_v46 }
0x15f9   :  { %2366 = vtanh.f32 %v1753_v41 }
0x1602   :  { %v2365_v42 = vpop.eup %2364 }
0x1603   :  { %v1756_v1 = vadd.f32 1.0, %v2365_v42 }
0x1605   :  { %v1758_v50 = vmul.f32 %v1756_v1, %v1742_v47 }
0x1606   :  { %v2367_v44 = vpop.eup %2366 }
0x1607   :  { %v1757_v49 = vadd.f32 1.0, %v2367_v44 }
0x1609   :  { %v1759_v51 = vmul.f32 %v1757_v49, %v1743_v48 }
0x160b   :  { %v1760_v52 = vpack.c.bf16 %v1759_v51, %v1758_v50 }
0x160d   :  { %2296 = vmatmul.mubr.bf16.vlgmr.msra.gmra.mxu0 %v1760_v52 }
0x16cd   :  { %v1819_v53 = vpop.f32.mrf.mxu0 }
0x16ce   :  { %v1826_v54 = vadd.f32 %v1819_v53, %v2742_v24 }
0x16cf   :  { %v2297_v55 = vpop.f32.mrf.mxu0 }
0x16d0   :  { %v1833_v56 = vadd.f32 %v1984_v37, %v1826_v54 }
0x16d1   :  { %v1822_v57 = vpop.f32.mrf.mxu0 }
0x16d2   :  { %v1827_v43 = vadd.f32 %v1822_v57, %v2747_v29  ;;  %v1835_v58 = vsel %vm48_vm0, %v1833_v56, 0.0 }
0x16d3   :  { %1836 = vadd.xlane.f32.xlu0 %v1835_v58  ;;  %v2298_v59 = vpop.f32.mrf.mxu0 }
0x16d4   :  { %v1834_v60 = vadd.f32 %v1984_v37, %v1827_v43 }
0x16d6   :  { %v1838_v61 = vsel %vm48_vm0, %v1834_v60, 0.0 }
0x16d7   :  { %1839 = vadd.xlane.f32.xlu1 %v1838_v61 }
0x175c   :  { %v1837_v62 = vpop.xlane.xlu0 %1836 }
0x175d   :  { %v1841_v63 = vmul.f32 0.03125, %v1837_v62 }
0x175f   :  { %v1843_v2 = vsub.f32 %v1833_v56, %v1841_v63 }
0x1760   :  { %v1840_v4 = vpop.xlane.xlu1 %1839 }
0x1761   :  { %v1842_v5 = vmul.f32 0.03125, %v1840_v4  ;;  %v1845_v6 = vmul.f32 %v1843_v2, %v1843_v2 }
0x1763   :  { %v1844_v24 = vsub.f32 %v1834_v60, %v1842_v5  ;;  %v1847_v7 = vsel %vm48_vm0, %v1845_v6, 0.0 }
0x1764   :  { %1848 = vadd.xlane.f32.xlu0 %v1847_v7 }
0x1765   :  { %v1846_v9 = vmul.f32 %v1844_v24, %v1844_v24 }
0x1767   :  { %v1850_v29 = vsel %vm48_vm0, %v1846_v9, 0.0 }
0x1768   :  { %1851 = vadd.xlane.f32.xlu1 %v1850_v29 }
0x17ed   :  { %v1849_v35 = vpop.xlane.xlu0 %1848 }
0x17ee   :  { %v1853_v15 = vmul.f32 0.03125, %v1849_v35 }
0x17f0   :  { %v1855_v16 = vadd.f32 1e-05, %v1853_v15 }
0x17f1   :  { %v1852_v17 = vpop.xlane.xlu1 %1851 }
0x17f2   :  { %2368 = vrsqrt.f32 %v1855_v16  ;;  %v1854_v18 = vmul.f32 0.03125, %v1852_v17 }
0x17f4   :  { %v1856_v20 = vadd.f32 1e-05, %v1854_v18 }
0x17f6   :  { %2370 = vrsqrt.f32 %v1856_v20 }
0x17ff   :  { %v2369_v21 = vpop.eup %2368 }
0x1800   :  { %v1859_v22 = vmul.f32 %v2369_v21, %v1843_v2 }
0x1802   :  { %v1866_v27 = vmul.f32 %v1985_v23, %v1859_v22 }
0x1803   :  { %v2371_v25 = vpop.eup %2370 }
0x1804   :  { %v1860_v26 = vmul.f32 %v2371_v25, %v1844_v24  ;;  %v1873_v31 = vadd.f32 %v1986_v19, %v1866_v27 }
0x1806   :  { %v1867_v28 = vmul.f32 %v1985_v23, %v1860_v26 }
0x1808   :  { %v1874_v32 = vadd.f32 %v1986_v19, %v1867_v28 }
0x180a   :  { %v1875_v33 = vpack.c.bf16 %v1874_v32, %v1873_v31 }
0x180c   :  { %2304 = vmatmul.mubr.msk.bf16.vlgmr.msra.gmra.mxu1 %vm48_vm0, %v1875_v33 }
0x18cc   :  { %v1919_v3 = vpop.f32.mrf.mxu1 }
0x18cd   :  { %1926 = vst [vmem:[%s2814_s3] sm:$0xff] %v1919_v3 }
0x18ce   :  { %v2305_v34 = vpop.f32.mrf.mxu1 }
0x18d0   :  { %v1922_v36 = vpop.f32.mrf.mxu1 }
0x18d1   :  { %1927 = vst [vmem:[%s2814_s3 + $0x8] sm:$0xff] %v1922_v36 }
0x18d2   :  { %v2306_v38 = vpop.f32.mrf.mxu1 }
0x18d3   :  { %1932 = vsyncpa [#allocation3], 1 }

</bundles_post_ra>
